<compile_context>
chip_gen: v7x
topology: tpu7x:2x2x1
jax: 0.10.0
libtpu: 0.0.40
codegen_flags: <defaults>
</compile_context>

<pallas_src>
import math
import functools

import jax
import jax.numpy as jnp
from jax import lax
from jax.experimental import pallas as pl
from jax.experimental.pallas import tpu as pltpu


# --------------------------------------------------------------------------------------
# helpers
# --------------------------------------------------------------------------------------
def _const_spec(shape, index_map):
    """BlockSpec for a block whose index never changes: single-buffer it if supported."""
    try:
        return pl.BlockSpec(shape, index_map, pipeline_mode=pl.Buffered(1))
    except Exception:   # older/newer API without pipeline_mode -> default double-buffer
        return pl.BlockSpec(shape, index_map)


def _pick_vmem_limit():
    """Scoped-VMEM budget derived from the chip (v7x: 64 MiB phys -> ~48 MiB here)."""
    cap = 0
    try:
        cap = int(pltpu.get_tpu_info().vmem_capacity_bytes)
    except Exception:
        cap = 0
    if cap <= 0:
        cap = 128 * 1024 * 1024
    return int(min(cap * 3 // 4, 96 * 1024 * 1024))


# --------------------------------------------------------------------------------------
# stage 1: Q/K/V projections (one pass over the sequence, hoisted out of the flash loop)
# --------------------------------------------------------------------------------------
def _qkv_proj_kernel(xq_ref, xk_ref, xv_ref, wq_t_ref, wk_t_ref, wv_t_ref,
                     q_out, k_out, v_out, *, scale):
    f32, bf16 = jnp.float32, jnp.bfloat16
    q = jnp.dot(xq_ref[0], wq_t_ref[...], preferred_element_type=f32)
    # fold 1/sqrt(d_head) into Q once (saves a per-kv-step [h,bq,bkv] multiply later)
    q_out[0] = (q * scale).astype(bf16)
    k_out[0] = jnp.dot(xk_ref[0], wk_t_ref[...], preferred_element_type=f32).astype(bf16)
    v_out[0] = jnp.dot(xv_ref[0], wv_t_ref[...], preferred_element_type=f32).astype(bf16)


# --------------------------------------------------------------------------------------
# stage 2: flash-attention + output projection + residual + LayerNorm (fused epilogue)
# --------------------------------------------------------------------------------------
def _mha_flash_kernel(qh_ref, kh_ref, vh_ref, mask_ref, xq_ref,
                      wo_t_ref, gamma_ref, beta_ref,
                      out_ref,
                      m_scr, l_scr, acc_scr,
                      *, n_head, eps):
    kv_idx = pl.program_id(2)
    num_kv = pl.num_programs(2)
    f32, bf16 = jnp.float32, jnp.bfloat16

    # ---- init online-softmax state for a new (batch, q-tile) ----
    @pl.when(kv_idx == 0)
    def _init():
        m_scr[...] = jnp.full(m_scr.shape, -jnp.inf, f32)
        l_scr[...] = jnp.zeros(l_scr.shape, f32)
        acc_scr[...] = jnp.zeros(acc_scr.shape, f32)

    q = qh_ref[0]                                        # [h, bq,  dh] bf16 (pre-scaled)
    k = kh_ref[0]                                        # [h, bkv, dh] bf16
    v = vh_ref[0]                                        # [h, bkv, dh] bf16

    # ---- scores for all heads in one batched MXU einsum ----
    s = jnp.einsum('hqd,hkd->hqk', q, k, preferred_element_type=f32)   # [h, bq, bkv]
    masked = (mask_ref[0, 0] != 0)[None, :, :]                          # int8 -> bool
    s = jnp.where(masked, f32(-1e9), s)

    # ---- online softmax update ----
    m_prev = m_scr[...]                                                 # [h, bq, 1]
    m_new = jnp.maximum(m_prev, jnp.max(s, axis=-1, keepdims=True))
    alpha = jnp.exp(m_prev - m_new)
    p = jnp.exp(s - m_new)
    l_scr[...] = alpha * l_scr[...] + jnp.sum(p, axis=-1, keepdims=True)
    acc_scr[...] = alpha * acc_scr[...] + jnp.einsum(
        'hqk,hkd->hqd', p.astype(bf16), v, preferred_element_type=f32)
    m_scr[...] = m_new

    # ---- finalize: merge heads, output projection, residual, LayerNorm ----
    @pl.when(kv_idx == num_kv - 1)
    def _finalize():
        attn = acc_scr[...] / l_scr[...]                  # exact normalization (1x/q-tile)
        # head merge happens once per q-tile (not per kv step): [h, bq, dh] -> [bq, dff]
        attn2d = jnp.concatenate([attn[h] for h in range(n_head)], axis=-1)
        o = jnp.dot(attn2d.astype(bf16), wo_t_ref[...],
                    preferred_element_type=f32)           # [bq, d_model]
        y = o + xq_ref[0]                                 # residual with f32 input_Q
        mean = jnp.mean(y, axis=-1, keepdims=True)
        var = jnp.mean((y - mean) ** 2, axis=-1, keepdims=True)
        y_norm = (y - mean) * lax.rsqrt(var + eps)
        out_ref[0] = y_norm * gamma_ref[...] + beta_ref[...]


# --------------------------------------------------------------------------------------
# wrapper
# --------------------------------------------------------------------------------------
def multi_head_attention(input_q, input_k, input_v, attn_mask,
                         w_q, w_k, w_v, w_o, gamma, beta,
                         *, n_head, eps=1e-5, block_q=256, block_kv=256, block_proj=256):
    """input_*: [B, m, d_model] f32; attn_mask: [B, 1, m, m] (nonzero = masked)."""
    B, m, d_model = input_q.shape
    dff = w_q.shape[0]
    assert dff % n_head == 0
    d_head = dff // n_head

    bq = m if m <= block_q else block_q
    bkv = m if m <= block_kv else block_kv
    bp = m if m <= block_proj else block_proj
    assert m % bq == 0 and m % bkv == 0 and m % bp == 0, \
        "sequence length must divide the tile sizes"

    f32, bf16 = jnp.float32, jnp.bfloat16

    # Host-side layout / dtype prep.  NOTE: wrap this whole function in jax.jit (as done
    # in __main__) so these casts/transposes happen at trace time, not per eager call.
    wq_t = jnp.asarray(w_q.T, bf16)                  # [d_model, dff]
    wk_t = jnp.asarray(w_k.T, bf16)
    wv_t = jnp.asarray(w_v.T, bf16)
    wo_t = jnp.asarray(w_o.T, bf16)                  # [dff, d_model]
    xq_b = input_q.astype(bf16)                      # streaming matmul operands in bf16
    xk_b = input_k.astype(bf16)
    xv_b = input_v.astype(bf16)
    mask_i8 = (attn_mask != 0).astype(jnp.int8)      # narrow mask DMA (4x less than f32)
    gamma2 = gamma.reshape(1, d_model).astype(f32)
    beta2 = beta.reshape(1, d_model).astype(f32)

    vmem_limit = _pick_vmem_limit()

    # ---------------- stage 1: hoisted Q/K/V projections ----------------
    x_spec = pl.BlockSpec((1, bp, d_model), lambda b, t: (b, t, 0))
    w_spec = _const_spec((d_model, dff), lambda b, t: (0, 0))
    p_out_spec = pl.BlockSpec((1, bp, dff), lambda b, t: (b, t, 0))

    q_p, k_p, v_p = pl.pallas_call(
        functools.partial(_qkv_proj_kernel, scale=float(1.0 / math.sqrt(d_head))),
        out_shape=(jax.ShapeDtypeStruct((B, m, dff), bf16),
                   jax.ShapeDtypeStruct((B, m, dff), bf16),
                   jax.ShapeDtypeStruct((B, m, dff), bf16)),
        grid_spec=pltpu.PrefetchScalarGridSpec(
            num_scalar_prefetch=0,
            grid=(B, m // bp),
            in_specs=[x_spec, x_spec, x_spec, w_spec, w_spec, w_spec],
            out_specs=[p_out_spec, p_out_spec, p_out_spec]),
        compiler_params=pltpu.CompilerParams(
            dimension_semantics=("parallel", "parallel"),
            vmem_limit_bytes=vmem_limit),
    )(xq_b, xk_b, xv_b, wq_t, wk_t, wv_t)

    # One-time relayout to head-major [B, n_head, m, d_head] (plain XLA transpose),
    # so the flash kernel streams head-major tiles with no per-step head splitting.
    def to_heads(x):
        return x.reshape(B, m, n_head, d_head).transpose(0, 2, 1, 3)
    qh, kh, vh = to_heads(q_p), to_heads(k_p), to_heads(v_p)

    # ---------------- stage 2: flash attention + fused epilogue ----------------
    grid = (B, m // bq, m // bkv)   # kv (reduction) axis innermost

    qh_spec = pl.BlockSpec((1, n_head, bq, d_head), lambda b, qi, ki: (b, 0, qi, 0))
    kvh_spec = pl.BlockSpec((1, n_head, bkv, d_head), lambda b, qi, ki: (b, 0, ki, 0))
    mask_spec = pl.BlockSpec((1, 1, bq, bkv), lambda b, qi, ki: (b, 0, qi, ki))
    xq_spec = pl.BlockSpec((1, bq, d_model), lambda b, qi, ki: (b, qi, 0))
    wo_spec = _const_spec((dff, d_model), lambda b, qi, ki: (0, 0))
    gb_spec = _const_spec((1, d_model), lambda b, qi, ki: (0, 0))
    out_spec = pl.BlockSpec((1, bq, d_model), lambda b, qi, ki: (b, qi, 0))

    kernel = functools.partial(_mha_flash_kernel, n_head=n_head, eps=float(eps))

    return pl.pallas_call(
        kernel,
        out_shape=jax.ShapeDtypeStruct((B, m, d_model), f32),
        grid_spec=pltpu.PrefetchScalarGridSpec(
            num_scalar_prefetch=0,
            grid=grid,
            in_specs=[qh_spec, kvh_spec, kvh_spec, mask_spec, xq_spec,
                      wo_spec, gb_spec, gb_spec],
            out_specs=out_spec,
            scratch_shapes=[
                pltpu.VMEM((n_head, bq, 1), f32),        # running max
                pltpu.VMEM((n_head, bq, 1), f32),        # running denominator
                pltpu.VMEM((n_head, bq, d_head), f32),   # output accumulator
            ]),
        compiler_params=pltpu.CompilerParams(
            dimension_semantics=("parallel", "parallel", "arbitrary"),
            vmem_limit_bytes=vmem_limit),
    )(qh, kh, vh, mask_i8, input_q, wo_t, gamma2, beta2)


# --------------------------------------------------------------------------------------
# pure-JAX reference (mirrors the PyTorch module in eval mode)
# --------------------------------------------------------------------------------------
def _reference(input_q, input_k, input_v, attn_mask,
               w_q, w_k, w_v, w_o, gamma, beta, *, n_head, eps=1e-5):
    B, m, d_model = input_q.shape
    dff = w_q.shape[0]
    d_head = dff // n_head
    q = (input_q @ w_q.T).reshape(B, m, n_head, d_head).transpose(0, 2, 1, 3)
    k = (input_k @ w_k.T).reshape(B, m, n_head, d_head).transpose(0, 2, 1, 3)
    v = (input_v @ w_v.T).reshape(B, m, n_head, d_head).transpose(0, 2, 1, 3)
    s = jnp.einsum("bhqd,bhkd->bhqk", q, k) / math.sqrt(d_head)
    s = jnp.where(attn_mask > 0.5, -1.0e9, s)
    p = jax.nn.softmax(s, axis=-1)
    a = jnp.einsum("bhqk,bhkd->bhqd", p, v)
    a = a.transpose(0, 2, 1, 3).reshape(B, m, dff)
    o = a @ w_o.T + input_q
    mean = o.mean(-1, keepdims=True)
    var = ((o - mean) ** 2).mean(-1, keepdims=True)
    return (o - mean) / jnp.sqrt(var + eps) * gamma + beta


if __name__ == "__main__":
    # Small shapes consistent with the module: batch=2, seq=8, d_model=32,
    # dim_feedforward=32, n_head=4 -> d_head=8.
    B, M, D_MODEL, DFF, N_HEAD = 2, 8, 32, 32, 4

    key = jax.random.PRNGKey(0)
    ks = jax.random.split(key, 7)
    input_q = jax.random.normal(ks[0], (B, M, D_MODEL), jnp.float32)
    input_k = jax.random.normal(ks[1], (B, M, D_MODEL), jnp.float32)
    input_v = jax.random.normal(ks[2], (B, M, D_MODEL), jnp.float32)

    # Causal-style mask (1.0 = masked), shape [B, 1, m, m].
    tri = jnp.triu(jnp.ones((M, M), jnp.float32), k=1)
    attn_mask = jnp.broadcast_to(tri, (B, 1, M, M)).astype(jnp.float32)

    w_scale = 1.0 / math.sqrt(D_MODEL)
    w_q = jax.random.normal(ks[3], (DFF, D_MODEL), jnp.float32) * w_scale
    w_k = jax.random.normal(ks[4], (DFF, D_MODEL), jnp.float32) * w_scale
    w_v = jax.random.normal(ks[5], (DFF, D_MODEL), jnp.float32) * w_scale
    w_o = jax.random.normal(ks[6], (D_MODEL, DFF), jnp.float32) * w_scale
    gamma = jnp.ones((D_MODEL,), jnp.float32)   # nn.LayerNorm default init
    beta = jnp.zeros((D_MODEL,), jnp.float32)

    mha = jax.jit(functools.partial(multi_head_attention, n_head=N_HEAD))
    out = mha(input_q, input_k, input_v, attn_mask, w_q, w_k, w_v, w_o, gamma, beta)
    out = jax.block_until_ready(out)

    ref = _reference(input_q, input_k, input_v, attn_mask,
                     w_q, w_k, w_v, w_o, gamma, beta, n_head=N_HEAD)
    assert out.shape == (B, M, D_MODEL)
    max_err = float(jnp.max(jnp.abs(out - ref)))
    # bf16 matmul operands => relaxed tolerance vs the f32 reference.
    assert jnp.allclose(out, ref, atol=3e-2, rtol=3e-2), \
        f"mismatch vs JAX reference (max abs err {max_err})"
    print("KERNEL_OK")
</pallas_src>

<mosaic_0001>
module attributes {stable_mosaic.version = 11 : i64} {
  func.func @_qkv_proj_kernel(%arg0: i32, %arg1: i32, %arg2: memref<1x8x32xbf16, #tpu.memory_space<vmem>>, %arg3: memref<1x8x32xbf16, #tpu.memory_space<vmem>>, %arg4: memref<1x8x32xbf16, #tpu.memory_space<vmem>>, %arg5: memref<32x32xbf16, #tpu.memory_space<vmem>>, %arg6: memref<32x32xbf16, #tpu.memory_space<vmem>>, %arg7: memref<32x32xbf16, #tpu.memory_space<vmem>>, %arg8: memref<1x8x32xbf16, #tpu.memory_space<vmem>>, %arg9: memref<1x8x32xbf16, #tpu.memory_space<vmem>>, %arg10: memref<1x8x32xbf16, #tpu.memory_space<vmem>>) attributes {dimension_semantics = [#tpu.dimension_semantics<parallel>, #tpu.dimension_semantics<parallel>], iteration_bounds = array<i64: 2, 1>, scalar_prefetch = 0 : i64, scratch_operands = 0 : i64, tpu.core_type = #tpu.core_type<tc>, window_params = [{transform_indices = @transform_0, window_bounds = array<i64: 1, 8, 32>}, {transform_indices = @transform_1, window_bounds = array<i64: 1, 8, 32>}, {transform_indices = @transform_2, window_bounds = array<i64: 1, 8, 32>}, {pipeline_mode = #tpu.pipeline_mode<synchronous>, transform_indices = @transform_3, window_bounds = array<i64: 32, 32>}, {pipeline_mode = #tpu.pipeline_mode<synchronous>, transform_indices = @transform_4, window_bounds = array<i64: 32, 32>}, {pipeline_mode = #tpu.pipeline_mode<synchronous>, transform_indices = @transform_5, window_bounds = array<i64: 32, 32>}, {transform_indices = @transform_6, window_bounds = array<i64: 1, 8, 32>}, {transform_indices = @transform_7, window_bounds = array<i64: 1, 8, 32>}, {transform_indices = @transform_8, window_bounds = array<i64: 1, 8, 32>}]} {
    %c0 = arith.constant 0 : index
    %c0_0 = arith.constant 0 : index
    %c0_1 = arith.constant 0 : index
    %0 = vector.load %arg2[%c0, %c0_0, %c0_1] : memref<1x8x32xbf16, #tpu.memory_space<vmem>>, vector<1x8x32xbf16>
    %1 = vector.shape_cast %0 : vector<1x8x32xbf16> to vector<8x32xbf16>
    %c0_2 = arith.constant 0 : index
    %c0_3 = arith.constant 0 : index
    %2 = vector.load %arg5[%c0_2, %c0_3] : memref<32x32xbf16, #tpu.memory_space<vmem>>, vector<32x32xbf16>
    %cst = arith.constant dense<0.000000e+00> : vector<8x32xf32>
    %3 = tpu.matmul %1, %2, %cst {dimension_numbers = #tpu.dot_dimension_numbers<[1], [0], [0], [1], [0, 0, 1, 1], [], []>} : vector<8x32xbf16>, vector<32x32xbf16>, vector<8x32xf32> -> vector<8x32xf32>
    %cst_4 = arith.constant 0.353553385 : f32
    %4 = vector.broadcast %cst_4 : f32 to vector<8x32xf32>
    %5 = arith.mulf %3, %4 : vector<8x32xf32>
    %6 = arith.truncf %5 : vector<8x32xf32> to vector<8x32xbf16>
    %c0_5 = arith.constant 0 : index
    %c0_6 = arith.constant 0 : index
    %c0_7 = arith.constant 0 : index
    %7 = vector.load %arg8[%c0_5, %c0_6, %c0_7] : memref<1x8x32xbf16, #tpu.memory_space<vmem>>, vector<1x8x32xbf16>
    %8 = vector.shape_cast %7 : vector<1x8x32xbf16> to vector<8x32xbf16>
    %9 = vector.shape_cast %6 : vector<8x32xbf16> to vector<1x8x32xbf16>
    tpu.vector_store %arg8[%c0_5, %c0_6, %c0_7], %9 {strides = array<i32>} : memref<1x8x32xbf16, #tpu.memory_space<vmem>>, vector<1x8x32xbf16>,
    %c0_8 = arith.constant 0 : index
    %c0_9 = arith.constant 0 : index
    %c0_10 = arith.constant 0 : index
    %10 = vector.load %arg3[%c0_8, %c0_9, %c0_10] : memref<1x8x32xbf16, #tpu.memory_space<vmem>>, vector<1x8x32xbf16>
    %11 = vector.shape_cast %10 : vector<1x8x32xbf16> to vector<8x32xbf16>
    %c0_11 = arith.constant 0 : index
    %c0_12 = arith.constant 0 : index
    %12 = vector.load %arg6[%c0_11, %c0_12] : memref<32x32xbf16, #tpu.memory_space<vmem>>, vector<32x32xbf16>
    %cst_13 = arith.constant dense<0.000000e+00> : vector<8x32xf32>
    %13 = tpu.matmul %11, %12, %cst_13 {dimension_numbers = #tpu.dot_dimension_numbers<[1], [0], [0], [1], [0, 0, 1, 1], [], []>} : vector<8x32xbf16>, vector<32x32xbf16>, vector<8x32xf32> -> vector<8x32xf32>
    %14 = arith.truncf %13 : vector<8x32xf32> to vector<8x32xbf16>
    %c0_14 = arith.constant 0 : index
    %c0_15 = arith.constant 0 : index
    %c0_16 = arith.constant 0 : index
    %15 = vector.load %arg9[%c0_14, %c0_15, %c0_16] : memref<1x8x32xbf16, #tpu.memory_space<vmem>>, vector<1x8x32xbf16>
    %16 = vector.shape_cast %15 : vector<1x8x32xbf16> to vector<8x32xbf16>
    %17 = vector.shape_cast %14 : vector<8x32xbf16> to vector<1x8x32xbf16>
    tpu.vector_store %arg9[%c0_14, %c0_15, %c0_16], %17 {strides = array<i32>} : memref<1x8x32xbf16, #tpu.memory_space<vmem>>, vector<1x8x32xbf16>,
    %c0_17 = arith.constant 0 : index
    %c0_18 = arith.constant 0 : index
    %c0_19 = arith.constant 0 : index
    %18 = vector.load %arg4[%c0_17, %c0_18, %c0_19] : memref<1x8x32xbf16, #tpu.memory_space<vmem>>, vector<1x8x32xbf16>
    %19 = vector.shape_cast %18 : vector<1x8x32xbf16> to vector<8x32xbf16>
    %c0_20 = arith.constant 0 : index
    %c0_21 = arith.constant 0 : index
    %20 = vector.load %arg7[%c0_20, %c0_21] : memref<32x32xbf16, #tpu.memory_space<vmem>>, vector<32x32xbf16>
    %cst_22 = arith.constant dense<0.000000e+00> : vector<8x32xf32>
    %21 = tpu.matmul %19, %20, %cst_22 {dimension_numbers = #tpu.dot_dimension_numbers<[1], [0], [0], [1], [0, 0, 1, 1], [], []>} : vector<8x32xbf16>, vector<32x32xbf16>, vector<8x32xf32> -> vector<8x32xf32>
    %22 = arith.truncf %21 : vector<8x32xf32> to vector<8x32xbf16>
    %c0_23 = arith.constant 0 : index
    %c0_24 = arith.constant 0 : index
    %c0_25 = arith.constant 0 : index
    %23 = vector.load %arg10[%c0_23, %c0_24, %c0_25] : memref<1x8x32xbf16, #tpu.memory_space<vmem>>, vector<1x8x32xbf16>
    %24 = vector.shape_cast %23 : vector<1x8x32xbf16> to vector<8x32xbf16>
    %25 = vector.shape_cast %22 : vector<8x32xbf16> to vector<1x8x32xbf16>
    tpu.vector_store %arg10[%c0_23, %c0_24, %c0_25], %25 {strides = array<i32>} : memref<1x8x32xbf16, #tpu.memory_space<vmem>>, vector<1x8x32xbf16>,
    return
  }
  func.func @transform_0(%arg0: i32, %arg1: i32) -> (i32, i32, i32) {
    %c0_i32 = arith.constant 0 : i32
    %c0_i32_0 = arith.constant 0 : i32
    return %arg0, %arg1, %c0_i32 : i32, i32, i32
  }
  func.func @transform_1(%arg0: i32, %arg1: i32) -> (i32, i32, i32) {
    %c0_i32 = arith.constant 0 : i32
    %c0_i32_0 = arith.constant 0 : i32
    return %arg0, %arg1, %c0_i32 : i32, i32, i32
  }
  func.func @transform_2(%arg0: i32, %arg1: i32) -> (i32, i32, i32) {
    %c0_i32 = arith.constant 0 : i32
    %c0_i32_0 = arith.constant 0 : i32
    return %arg0, %arg1, %c0_i32 : i32, i32, i32
  }
  func.func @transform_3(%arg0: i32, %arg1: i32) -> (i32, i32) {
    %c0_i32 = arith.constant 0 : i32
    %c0_i32_0 = arith.constant 0 : i32
    %c0_i32_1 = arith.constant 0 : i32
    return %c0_i32, %c0_i32_0 : i32, i32
  }
  func.func @transform_4(%arg0: i32, %arg1: i32) -> (i32, i32) {
    %c0_i32 = arith.constant 0 : i32
    %c0_i32_0 = arith.constant 0 : i32
    %c0_i32_1 = arith.constant 0 : i32
    return %c0_i32, %c0_i32_0 : i32, i32
  }
  func.func @transform_5(%arg0: i32, %arg1: i32) -> (i32, i32) {
    %c0_i32 = arith.constant 0 : i32
    %c0_i32_0 = arith.constant 0 : i32
    %c0_i32_1 = arith.constant 0 : i32
    return %c0_i32, %c0_i32_0 : i32, i32
  }
  func.func @transform_6(%arg0: i32, %arg1: i32) -> (i32, i32, i32) {
    %c0_i32 = arith.constant 0 : i32
    %c0_i32_0 = arith.constant 0 : i32
    return %arg0, %arg1, %c0_i32 : i32, i32, i32
  }
  func.func @transform_7(%arg0: i32, %arg1: i32) -> (i32, i32, i32) {
    %c0_i32 = arith.constant 0 : i32
    %c0_i32_0 = arith.constant 0 : i32
    return %arg0, %arg1, %c0_i32 : i32, i32, i32
  }
  func.func @transform_8(%arg0: i32, %arg1: i32) -> (i32, i32, i32) {
    %c0_i32 = arith.constant 0 : i32
    %c0_i32_0 = arith.constant 0 : i32
    return %arg0, %arg1, %c0_i32 : i32, i32, i32
  }
}

module attributes {stable_mosaic.version = 11 : i64} {
  func.func @_mha_flash_kernel(%arg0: i32, %arg1: i32, %arg2: i32, %arg3: memref<1x4x8x8xbf16, #tpu.memory_space<vmem>>, %arg4: memref<1x4x8x8xbf16, #tpu.memory_space<vmem>>, %arg5: memref<1x4x8x8xbf16, #tpu.memory_space<vmem>>, %arg6: memref<1x1x8x8xi8, #tpu.memory_space<vmem>>, %arg7: memref<1x8x32xf32, #tpu.memory_space<vmem>>, %arg8: memref<32x32xbf16, #tpu.memory_space<vmem>>, %arg9: memref<1x32xf32, #tpu.memory_space<vmem>>, %arg10: memref<1x32xf32, #tpu.memory_space<vmem>>, %arg11: memref<1x8x32xf32, #tpu.memory_space<vmem>>, %arg12: memref<4x8x1xf32, #tpu.memory_space<vmem>>, %arg13: memref<4x8x1xf32, #tpu.memory_space<vmem>>, %arg14: memref<4x8x8xf32, #tpu.memory_space<vmem>>) attributes {dimension_semantics = [#tpu.dimension_semantics<parallel>, #tpu.dimension_semantics<parallel>, #tpu.dimension_semantics<arbitrary>], iteration_bounds = array<i64: 2, 1, 1>, scalar_prefetch = 0 : i64, scratch_operands = 3 : i64, tpu.core_type = #tpu.core_type<tc>, window_params = [{transform_indices = @transform_0, window_bounds = array<i64: 1, 4, 8, 8>}, {transform_indices = @transform_1, window_bounds = array<i64: 1, 4, 8, 8>}, {transform_indices = @transform_2, window_bounds = array<i64: 1, 4, 8, 8>}, {transform_indices = @transform_3, window_bounds = array<i64: 1, 1, 8, 8>}, {transform_indices = @transform_4, window_bounds = array<i64: 1, 8, 32>}, {pipeline_mode = #tpu.pipeline_mode<synchronous>, transform_indices = @transform_5, window_bounds = array<i64: 32, 32>}, {pipeline_mode = #tpu.pipeline_mode<synchronous>, transform_indices = @transform_6, window_bounds = array<i64: 1, 32>}, {pipeline_mode = #tpu.pipeline_mode<synchronous>, transform_indices = @transform_7, window_bounds = array<i64: 1, 32>}, {transform_indices = @transform_8, window_bounds = array<i64: 1, 8, 32>}]} {
    %c0_i32 = arith.constant 0 : i32
    %0 = arith.cmpi eq, %arg2, %c0_i32 : i32
    %1 = arith.extui %0 : i1 to i32
    %c0_i32_0 = arith.constant 0 : i32
    %2 = arith.cmpi ne, %1, %c0_i32_0 : i32
    scf.if %2 {
      %cst_40 = arith.constant 0xFF800000 : f32
      %45 = vector.broadcast %cst_40 : f32 to vector<4x8x1xf32>
      %c0_41 = arith.constant 0 : index
      %c0_42 = arith.constant 0 : index
      %c0_43 = arith.constant 0 : index
      %46 = vector.load %arg12[%c0_41, %c0_42, %c0_43] : memref<4x8x1xf32, #tpu.memory_space<vmem>>, vector<4x8x1xf32>
      tpu.vector_store %arg12[%c0_41, %c0_42, %c0_43], %45 {strides = array<i32>} : memref<4x8x1xf32, #tpu.memory_space<vmem>>, vector<4x8x1xf32>,
      %cst_44 = arith.constant 0.000000e+00 : f32
      %47 = vector.broadcast %cst_44 : f32 to vector<4x8x1xf32>
      %c0_45 = arith.constant 0 : index
      %c0_46 = arith.constant 0 : index
      %c0_47 = arith.constant 0 : index
      %48 = vector.load %arg13[%c0_45, %c0_46, %c0_47] : memref<4x8x1xf32, #tpu.memory_space<vmem>>, vector<4x8x1xf32>
      tpu.vector_store %arg13[%c0_45, %c0_46, %c0_47], %47 {strides = array<i32>} : memref<4x8x1xf32, #tpu.memory_space<vmem>>, vector<4x8x1xf32>,
      %cst_48 = arith.constant 0.000000e+00 : f32
      %49 = vector.broadcast %cst_48 : f32 to vector<4x8x8xf32>
      %c0_49 = arith.constant 0 : index
      %c0_50 = arith.constant 0 : index
      %c0_51 = arith.constant 0 : index
      %50 = vector.load %arg14[%c0_49, %c0_50, %c0_51] : memref<4x8x8xf32, #tpu.memory_space<vmem>>, vector<4x8x8xf32>
      tpu.vector_store %arg14[%c0_49, %c0_50, %c0_51], %49 {strides = array<i32>} : memref<4x8x8xf32, #tpu.memory_space<vmem>>, vector<4x8x8xf32>,
    } else {
    }
    %c0 = arith.constant 0 : index
    %c0_1 = arith.constant 0 : index
    %c0_2 = arith.constant 0 : index
    %c0_3 = arith.constant 0 : index
    %3 = vector.load %arg3[%c0, %c0_1, %c0_2, %c0_3] : memref<1x4x8x8xbf16, #tpu.memory_space<vmem>>, vector<1x4x8x8xbf16>
    %4 = vector.shape_cast %3 : vector<1x4x8x8xbf16> to vector<4x8x8xbf16>
    %c0_4 = arith.constant 0 : index
    %c0_5 = arith.constant 0 : index
    %c0_6 = arith.constant 0 : index
    %c0_7 = arith.constant 0 : index
    %5 = vector.load %arg4[%c0_4, %c0_5, %c0_6, %c0_7] : memref<1x4x8x8xbf16, #tpu.memory_space<vmem>>, vector<1x4x8x8xbf16>
    %6 = vector.shape_cast %5 : vector<1x4x8x8xbf16> to vector<4x8x8xbf16>
    %c0_8 = arith.constant 0 : index
    %c0_9 = arith.constant 0 : index
    %c0_10 = arith.constant 0 : index
    %c0_11 = arith.constant 0 : index
    %7 = vector.load %arg5[%c0_8, %c0_9, %c0_10, %c0_11] : memref<1x4x8x8xbf16, #tpu.memory_space<vmem>>, vector<1x4x8x8xbf16>
    %8 = vector.shape_cast %7 : vector<1x4x8x8xbf16> to vector<4x8x8xbf16>
    "tpu.trace_start"() <{level = 10 : i32, message = "hqd,hkd->hqk"}> : () -> ()
    %cst = arith.constant dense<0.000000e+00> : vector<4x8x8xf32>
    %9 = tpu.matmul %4, %6, %cst {dimension_numbers = #tpu.dot_dimension_numbers<[2], [2], [1], [1], [0, 0, 0, 1, 1, 1], [0], [0]>} : vector<4x8x8xbf16>, vector<4x8x8xbf16>, vector<4x8x8xf32> -> vector<4x8x8xf32>
    "tpu.trace_stop"() : () -> ()
    %c0_12 = arith.constant 0 : index
    %c0_13 = arith.constant 0 : index
    %c0_14 = arith.constant 0 : index
    %c0_15 = arith.constant 0 : index
    %10 = vector.load %arg6[%c0_12, %c0_13, %c0_14, %c0_15] : memref<1x1x8x8xi8, #tpu.memory_space<vmem>>, vector<1x1x8x8xi8>
    %11 = vector.shape_cast %10 : vector<1x1x8x8xi8> to vector<8x8xi8>
    %c0_i8 = arith.constant 0 : i8
    %12 = vector.broadcast %c0_i8 : i8 to vector<8x8xi8>
    %13 = arith.cmpi ne, %11, %12 : vector<8x8xi8>
    %14 = vector.shape_cast %13 : vector<8x8xi1> to vector<1x8x8xi1>
    %cst_16 = arith.constant -1.000000e+09 : f32
    %15 = vector.shape_cast %14 : vector<1x8x8xi1> to vector<1x8x8xi1>
    %16 = vector.broadcast %15 : vector<1x8x8xi1> to vector<4x8x8xi1>
    %17 = vector.broadcast %cst_16 : f32 to vector<4x8x8xf32>
    %18 = arith.select %16, %17, %9 : vector<4x8x8xi1>, vector<4x8x8xf32>
    %c0_17 = arith.constant 0 : index
    %c0_18 = arith.constant 0 : index
    %c0_19 = arith.constant 0 : index
    %19 = vector.load %arg12[%c0_17, %c0_18, %c0_19] : memref<4x8x1xf32, #tpu.memory_space<vmem>>, vector<4x8x1xf32>
    %cst_20 = arith.constant dense<0xFF800000> : vector<4x8xf32>
    %20 = vector.multi_reduction <maximumf>, %18, %cst_20 [2] : vector<4x8x8xf32> to vector<4x8xf32>
    %21 = vector.shape_cast %20 : vector<4x8xf32> to vector<4x8x1xf32>
    %22 = arith.maximumf %19, %21 : vector<4x8x1xf32>
    %23 = arith.subf %19, %22 : vector<4x8x1xf32>
    %24 = math.exp %23 : vector<4x8x1xf32>
    %25 = vector.broadcast %22 : vector<4x8x1xf32> to vector<4x8x8xf32>
    %26 = arith.subf %18, %25 : vector<4x8x8xf32>
    %27 = math.exp %26 : vector<4x8x8xf32>
    %c0_21 = arith.constant 0 : index
    %c0_22 = arith.constant 0 : index
    %c0_23 = arith.constant 0 : index
    %28 = vector.load %arg13[%c0_21, %c0_22, %c0_23] : memref<4x8x1xf32, #tpu.memory_space<vmem>>, vector<4x8x1xf32>
    %29 = arith.mulf %24, %28 : vector<4x8x1xf32>
    %cst_24 = arith.constant dense<0.000000e+00> : vector<4x8xf32>
    %30 = vector.multi_reduction <add>, %27, %cst_24 [2] : vector<4x8x8xf32> to vector<4x8xf32>
    %31 = vector.shape_cast %30 : vector<4x8xf32> to vector<4x8x1xf32>
    %32 = arith.addf %29, %31 : vector<4x8x1xf32>
    %c0_25 = arith.constant 0 : index
    %c0_26 = arith.constant 0 : index
    %c0_27 = arith.constant 0 : index
    %33 = vector.load %arg13[%c0_25, %c0_26, %c0_27] : memref<4x8x1xf32, #tpu.memory_space<vmem>>, vector<4x8x1xf32>
    tpu.vector_store %arg13[%c0_25, %c0_26, %c0_27], %32 {strides = array<i32>} : memref<4x8x1xf32, #tpu.memory_space<vmem>>, vector<4x8x1xf32>,
    %c0_28 = arith.constant 0 : index
    %c0_29 = arith.constant 0 : index
    %c0_30 = arith.constant 0 : index
    %34 = vector.load %arg14[%c0_28, %c0_29, %c0_30] : memref<4x8x8xf32, #tpu.memory_space<vmem>>, vector<4x8x8xf32>
    %35 = vector.broadcast %24 : vector<4x8x1xf32> to vector<4x8x8xf32>
    %36 = arith.mulf %35, %34 : vector<4x8x8xf32>
    %37 = arith.truncf %27 : vector<4x8x8xf32> to vector<4x8x8xbf16>
    "tpu.trace_start"() <{level = 10 : i32, message = "hqk,hkd->hqd"}> : () -> ()
    %cst_31 = arith.constant dense<0.000000e+00> : vector<4x8x8xf32>
    %38 = tpu.matmul %37, %8, %cst_31 {dimension_numbers = #tpu.dot_dimension_numbers<[2], [1], [1], [2], [0, 0, 0, 1, 1, 2], [0], [0]>} : vector<4x8x8xbf16>, vector<4x8x8xbf16>, vector<4x8x8xf32> -> vector<4x8x8xf32>
    "tpu.trace_stop"() : () -> ()
    %39 = arith.addf %36, %38 : vector<4x8x8xf32>
    %c0_32 = arith.constant 0 : index
    %c0_33 = arith.constant 0 : index
    %c0_34 = arith.constant 0 : index
    %40 = vector.load %arg14[%c0_32, %c0_33, %c0_34] : memref<4x8x8xf32, #tpu.memory_space<vmem>>, vector<4x8x8xf32>
    tpu.vector_store %arg14[%c0_32, %c0_33, %c0_34], %39 {strides = array<i32>} : memref<4x8x8xf32, #tpu.memory_space<vmem>>, vector<4x8x8xf32>,
    %c0_35 = arith.constant 0 : index
    %c0_36 = arith.constant 0 : index
    %c0_37 = arith.constant 0 : index
    %41 = vector.load %arg12[%c0_35, %c0_36, %c0_37] : memref<4x8x1xf32, #tpu.memory_space<vmem>>, vector<4x8x1xf32>
    tpu.vector_store %arg12[%c0_35, %c0_36, %c0_37], %22 {strides = array<i32>} : memref<4x8x1xf32, #tpu.memory_space<vmem>>, vector<4x8x1xf32>,
    %c0_i32_38 = arith.constant 0 : i32
    %42 = arith.cmpi eq, %arg2, %c0_i32_38 : i32
    %43 = arith.extui %42 : i1 to i32
    %c0_i32_39 = arith.constant 0 : i32
    %44 = arith.cmpi ne, %43, %c0_i32_39 : i32
    scf.if %44 {
      %c0_40 = arith.constant 0 : index
      %c0_41 = arith.constant 0 : index
      %c0_42 = arith.constant 0 : index
      %45 = vector.load %arg14[%c0_40, %c0_41, %c0_42] : memref<4x8x8xf32, #tpu.memory_space<vmem>>, vector<4x8x8xf32>
      %c0_43 = arith.constant 0 : index
      %c0_44 = arith.constant 0 : index
      %c0_45 = arith.constant 0 : index
      %46 = vector.load %arg13[%c0_43, %c0_44, %c0_45] : memref<4x8x1xf32, #tpu.memory_space<vmem>>, vector<4x8x1xf32>
      %47 = vector.broadcast %46 : vector<4x8x1xf32> to vector<4x8x8xf32>
      %48 = arith.divf %45, %47 : vector<4x8x8xf32>
      %49 = vector.extract_strided_slice %48 {offsets = [0, 0, 0], sizes = [1, 8, 8], strides = [1, 1, 1]} : vector<4x8x8xf32> to vector<1x8x8xf32>
      %50 = vector.shape_cast %49 : vector<1x8x8xf32> to vector<8x8xf32>
      %51 = vector.extract_strided_slice %48 {offsets = [1, 0, 0], sizes = [1, 8, 8], strides = [1, 1, 1]} : vector<4x8x8xf32> to vector<1x8x8xf32>
      %52 = vector.shape_cast %51 : vector<1x8x8xf32> to vector<8x8xf32>
      %53 = vector.extract_strided_slice %48 {offsets = [2, 0, 0], sizes = [1, 8, 8], strides = [1, 1, 1]} : vector<4x8x8xf32> to vector<1x8x8xf32>
      %54 = vector.shape_cast %53 : vector<1x8x8xf32> to vector<8x8xf32>
      %55 = vector.extract_strided_slice %48 {offsets = [3, 0, 0], sizes = [1, 8, 8], strides = [1, 1, 1]} : vector<4x8x8xf32> to vector<1x8x8xf32>
      %56 = vector.shape_cast %55 : vector<1x8x8xf32> to vector<8x8xf32>
      %57 = tpu.concatenate %50, %52, %54, %56 in 1 : vector<8x8xf32>, vector<8x8xf32>, vector<8x8xf32>, vector<8x8xf32> -> vector<8x32xf32>
      %58 = arith.truncf %57 : vector<8x32xf32> to vector<8x32xbf16>
      %c0_46 = arith.constant 0 : index
      %c0_47 = arith.constant 0 : index
      %59 = vector.load %arg8[%c0_46, %c0_47] : memref<32x32xbf16, #tpu.memory_space<vmem>>, vector<32x32xbf16>
      %cst_48 = arith.constant dense<0.000000e+00> : vector<8x32xf32>
      %60 = tpu.matmul %58, %59, %cst_48 {dimension_numbers = #tpu.dot_dimension_numbers<[1], [0], [0], [1], [0, 0, 1, 1], [], []>} : vector<8x32xbf16>, vector<32x32xbf16>, vector<8x32xf32> -> vector<8x32xf32>
      %c0_49 = arith.constant 0 : index
      %c0_50 = arith.constant 0 : index
      %c0_51 = arith.constant 0 : index
      %61 = vector.load %arg7[%c0_49, %c0_50, %c0_51] : memref<1x8x32xf32, #tpu.memory_space<vmem>>, vector<1x8x32xf32>
      %62 = vector.shape_cast %61 : vector<1x8x32xf32> to vector<8x32xf32>
      %63 = arith.addf %60, %62 : vector<8x32xf32>
      %cst_52 = arith.constant dense<0.000000e+00> : vector<8xf32>
      %64 = vector.multi_reduction <add>, %63, %cst_52 [1] : vector<8x32xf32> to vector<8xf32>
      %65 = vector.shape_cast %64 : vector<8xf32> to vector<8x1xf32>
      %cst_53 = arith.constant 3.200000e+01 : f32
      %66 = vector.broadcast %cst_53 : f32 to vector<8x1xf32>
      %67 = arith.divf %65, %66 : vector<8x1xf32>
      %68 = vector.broadcast %67 : vector<8x1xf32> to vector<8x32xf32>
      %69 = arith.subf %63, %68 : vector<8x32xf32>
      %70 = arith.mulf %69, %69 : vector<8x32xf32>
      %cst_54 = arith.constant dense<0.000000e+00> : vector<8xf32>
      %71 = vector.multi_reduction <add>, %70, %cst_54 [1] : vector<8x32xf32> to vector<8xf32>
      %72 = vector.shape_cast %71 : vector<8xf32> to vector<8x1xf32>
      %cst_55 = arith.constant 3.200000e+01 : f32
      %73 = vector.broadcast %cst_55 : f32 to vector<8x1xf32>
      %74 = arith.divf %72, %73 : vector<8x1xf32>
      %75 = vector.broadcast %67 : vector<8x1xf32> to vector<8x32xf32>
      %76 = arith.subf %63, %75 : vector<8x32xf32>
      %cst_56 = arith.constant 9.99999974E-6 : f32
      %77 = vector.broadcast %cst_56 : f32 to vector<8x1xf32>
      %78 = arith.addf %74, %77 : vector<8x1xf32>
      %79 = math.rsqrt %78 : vector<8x1xf32>
      %80 = vector.broadcast %79 : vector<8x1xf32> to vector<8x32xf32>
      %81 = arith.mulf %76, %80 : vector<8x32xf32>
      %c0_57 = arith.constant 0 : index
      %c0_58 = arith.constant 0 : index
      %82 = vector.load %arg9[%c0_57, %c0_58] : memref<1x32xf32, #tpu.memory_space<vmem>>, vector<1x32xf32>
      %83 = vector.broadcast %82 : vector<1x32xf32> to vector<8x32xf32>
      %84 = arith.mulf %81, %83 : vector<8x32xf32>
      %c0_59 = arith.constant 0 : index
      %c0_60 = arith.constant 0 : index
      %85 = vector.load %arg10[%c0_59, %c0_60] : memref<1x32xf32, #tpu.memory_space<vmem>>, vector<1x32xf32>
      %86 = vector.broadcast %85 : vector<1x32xf32> to vector<8x32xf32>
      %87 = arith.addf %84, %86 : vector<8x32xf32>
      %c0_61 = arith.constant 0 : index
      %c0_62 = arith.constant 0 : index
      %c0_63 = arith.constant 0 : index
      %88 = vector.load %arg11[%c0_61, %c0_62, %c0_63] : memref<1x8x32xf32, #tpu.memory_space<vmem>>, vector<1x8x32xf32>
      %89 = vector.shape_cast %88 : vector<1x8x32xf32> to vector<8x32xf32>
      %90 = vector.shape_cast %87 : vector<8x32xf32> to vector<1x8x32xf32>
      tpu.vector_store %arg11[%c0_61, %c0_62, %c0_63], %90 {strides = array<i32>} : memref<1x8x32xf32, #tpu.memory_space<vmem>>, vector<1x8x32xf32>,
    } else {
    }
    return
  }
  func.func @transform_0(%arg0: i32, %arg1: i32, %arg2: i32) -> (i32, i32, i32, i32) {
    %c0_i32 = arith.constant 0 : i32
    %c0_i32_0 = arith.constant 0 : i32
    %c0_i32_1 = arith.constant 0 : i32
    return %arg0, %c0_i32, %arg1, %c0_i32_0 : i32, i32, i32, i32
  }
  func.func @transform_1(%arg0: i32, %arg1: i32, %arg2: i32) -> (i32, i32, i32, i32) {
    %c0_i32 = arith.constant 0 : i32
    %c0_i32_0 = arith.constant 0 : i32
    %c0_i32_1 = arith.constant 0 : i32
    return %arg0, %c0_i32, %arg2, %c0_i32_0 : i32, i32, i32, i32
  }
  func.func @transform_2(%arg0: i32, %arg1: i32, %arg2: i32) -> (i32, i32, i32, i32) {
    %c0_i32 = arith.constant 0 : i32
    %c0_i32_0 = arith.constant 0 : i32
    %c0_i32_1 = arith.constant 0 : i32
    return %arg0, %c0_i32, %arg2, %c0_i32_0 : i32, i32, i32, i32
  }
  func.func @transform_3(%arg0: i32, %arg1: i32, %arg2: i32) -> (i32, i32, i32, i32) {
    %c0_i32 = arith.constant 0 : i32
    %c0_i32_0 = arith.constant 0 : i32
    return %arg0, %c0_i32, %arg1, %arg2 : i32, i32, i32, i32
  }
  func.func @transform_4(%arg0: i32, %arg1: i32, %arg2: i32) -> (i32, i32, i32) {
    %c0_i32 = arith.constant 0 : i32
    %c0_i32_0 = arith.constant 0 : i32
    return %arg0, %arg1, %c0_i32 : i32, i32, i32
  }
  func.func @transform_5(%arg0: i32, %arg1: i32, %arg2: i32) -> (i32, i32) {
    %c0_i32 = arith.constant 0 : i32
    %c0_i32_0 = arith.constant 0 : i32
    %c0_i32_1 = arith.constant 0 : i32
    return %c0_i32, %c0_i32_0 : i32, i32
  }
  func.func @transform_6(%arg0: i32, %arg1: i32, %arg2: i32) -> (i32, i32) {
    %c0_i32 = arith.constant 0 : i32
    %c0_i32_0 = arith.constant 0 : i32
    %c0_i32_1 = arith.constant 0 : i32
    return %c0_i32, %c0_i32_0 : i32, i32
  }
  func.func @transform_7(%arg0: i32, %arg1: i32, %arg2: i32) -> (i32, i32) {
    %c0_i32 = arith.constant 0 : i32
    %c0_i32_0 = arith.constant 0 : i32
    %c0_i32_1 = arith.constant 0 : i32
    return %c0_i32, %c0_i32_0 : i32, i32
  }
  func.func @transform_8(%arg0: i32, %arg1: i32, %arg2: i32) -> (i32, i32, i32) {
    %c0_i32 = arith.constant 0 : i32
    %c0_i32_0 = arith.constant 0 : i32
    return %arg0, %arg1, %c0_i32 : i32, i32, i32
  }
}

</mosaic_0001>

<bundles_post_ra>
// kernel: multi_head_attention.2
= control target key start
LH: loop header
LB: loop body
LE: loop exit
PB: predicated region body
PF: predicated region fallthrough
CT: control target
= control target key end

     0   :  { %s1955_s0 = inlined_call_operand.hbm [shape: bf16[2,8,32], index: 0, kind: input, shape index: {}]   ;;  %s1956_s1 = inlined_call_operand.hbm [shape: bf16[2,8,32], index: 1, kind: input, shape index: {}]   ;;  %s1957_s2 = inlined_call_operand.hbm [shape: bf16[2,8,32], index: 2, kind: input, shape index: {}]   ;;  %s1958_s3 = inlined_call_operand.hbm [shape: bf16[32,32], index: 3, kind: input, shape index: {}]   ;;  %s1959_s4 = inlined_call_operand.hbm [shape: bf16[32,32], index: 4, kind: input, shape index: {}]   ;;  %s1960_s5 = inlined_call_operand.hbm [shape: bf16[32,32], index: 5, kind: input, shape index: {}]   ;;  %s1961_s6 = inlined_call_operand.hbm [shape: bf16[2,8,32], index: 6, kind: output, shape index: {0}]   ;;  %s1962_s7 = inlined_call_operand.hbm [shape: bf16[2,8,32], index: 7, kind: output, shape index: {1}]   ;;  %s1963_s8 = inlined_call_operand.hbm [shape: bf16[2,8,32], index: 8, kind: output, shape index: {2}]  }
   0x1   :  { %1993 = sst [smem:[#allocation30_spill]] %s1956_s1 }
   0x2   :  { %1994 = sst [smem:[#allocation31_spill]] %s1958_s3 }
   0x3   :  { %1995 = sst [smem:[#allocation32_spill]] %s1961_s6 }
   0x4   :  { %1996 = sst [smem:[#allocation33_spill]] %s1962_s7 }
   0x5   :  { %1997 = sst [smem:[#allocation34_spill]] %s1963_s8 }
   0x6   :  { %14 = vsyncpa [#allocation3], 0 }
   0x7   :  { %16 = vsyncpa [#allocation3 + $0x1], 0 }
   0x8   :  { %17 = vsyncpa [#allocation6], 0 }
   0x9   :  { %19 = vsyncpa [#allocation6 + $0x1], 0 }
   0xa   :  { %20 = vsyncpa [#allocation9], 0 }
   0xb   :  { %21 = vsyncpa [#allocation12], 0 }
   0xc   :  { %22 = vsyncpa [#allocation4], 0 }
   0xd   :  { %24 = vsyncpa [#allocation4 + $0x1], 0 }
   0xe   :  { %25 = vsyncpa [#allocation15], 0 }
   0xf   :  { %27 = vsyncpa [#allocation15 + $0x1], 0  ;;  %s1525_s27 = smov 0   ;;  %s1527_s28 = smov 0  }
  0x10   :  { %s1529_s29 = smov 0   ;;  %s1531_s30 = smov 0  }
  0x11   :  { %s1533_s9 = smov 0   ;;  %s1535_s10 = smov 0  }
  0x12 LB: > { %1998 = sst [smem:[#allocation23_spill]] %s1445_s27  ;;  %s1556_s11 = sadd.s32 4294967295, %s1465_s10   ;;  %s1465_s10 = sphi %s1535_s10, %s33_s10   ;;  %s1461_s9 = sphi %s1533_s9, %s2044_s9   ;;  %s1457_s30 = sphi %s1531_s30, %s2043_s30   ;;  %s1453_s29 = sphi %s1529_s29, %s2047_s29   ;;  %s1449_s28 = sphi %s1527_s28, %s2046_s28   ;;  %s1445_s27 = sphi %s1525_s27, %s2045_s27  }
  0x13   : > { %1999 = sst [smem:[#allocation24_spill]] %s1461_s9  ;;  %s1967_s12 = sadd.s32 4294967294, %s1465_s10  }
  0x14   : > { %2000 = sst [smem:[#allocation25_spill]] %s1465_s10  ;;  %p67_p0 = scmp.ne.s32.totalorder %s1449_s28, %s1445_s27 }
  0x15   : > { %p1964_p1 = scmp.eq.s32.totalorder %s1556_s11, 0  ;;  %p218_p3 = scmp.eq.s32.totalorder %s1967_s12, 1 }
  0x16   : > { %p943_p5 = scmp.ge.s32.totalorder %s1465_s10, 1  ;;  %p281_p7 = scmp.lt.s32.totalorder %s1465_s10, 3 }
  0x17   : > { %p1567_p4 = por %p1964_p1, %p67_p0  ;;  %p1572_p6 = por %p218_p3, %p67_p0 }
  0x18   : > { %p1577_p8 = pnand %p943_p5, %p281_p7  ;;  %s1467_s16 = smov [#allocation8]  }
  0x19   : > { %s2001_s13 = scalar_select %p1567_p4, 1, 0 }
  0x1a   : > { %s2002_s14 = scalar_select %p1572_p6, 1, 0 }
  0x1b   : > { %s2004_s15 = scalar_select %p1577_p8, 1, 0 }
  0x1c   : > { %2003 = sst [smem:[#allocation26_spill]] %s2002_s14  ;;  %s293_s17 = sshll.u32 %s1467_s16, 4  ;;  %s294_s17 = int_to_ptr.vmem [resolvable:$true] %s293_s17 }
  0x1d   : > { %p1038_p9 = pneg %p1577_p8  ;;  %s45_s19 = sadd.s32 1, %s1461_s9 }
  0x1e   : > { %s2006_s3 = sld [smem:[#allocation31_spill]] }
  0x1f   : > { %p1586_p11 = pnand %p1038_p9, %p1964_p1 }
  0x21   : > { %s2005_s18 = scalar_select %p1586_p11, 1, 0 }
  0x22   : > { %p1599_p13 = pneg %p1586_p11 }
  0x24   : > { %s1137_s22 = scalar_lea.hbm %s2006_s3, 256 }
  0x25   : > { %p1138_p12 = scmp.ne.s32.totalorder %s2006_s3, %s1137_s22  ;;  %p1144_p5 = scmp.lt.u32.totalorder %s1137_s22, %s2006_s3 }
  0x26   : > { %s2007_s25 = scalar_select %p1599_p13, 1, 0 }
  0x27   : > { %p1140_p0 = pnand %p1599_p13, %p1138_p12 }
  0x29   : > { %p1141_p3 = pneg %p1140_p0 }
  0x2b   : > { %p1146_p7 = pnand %p1144_p5, %p1141_p3 }
  0x2d   : > { %1149 = shalt.err (!%p1146_p7)
}
  0x2e   : > { %s1150_s20 = scalar_lea.vmem %s294_s17, 256  ;;  %p1158_p2 = scmp.lt.s32.totalorder %s294_s17, %s294_s17 }
  0x2f   : > { %p1151_p9 = scmp.ne.s32.totalorder %s294_s17, %s1150_s20  ;;  %p1159_p6 = scmp.lt.s32.totalorder %s1150_s20, %s1150_s20 }
  0x31   : > { %p1153_p10 = pnand %p1151_p9, %p1599_p13  ;;  %p1160_p4 = por %p1159_p6, %p1158_p2 }
  0x33   : > { %p1154_p1 = pneg %p1153_p10 }
  0x35   : > { %p1161_p8 = pnand %p1160_p4, %p1154_p1 }
  0x37   : > { %1164 = shalt.err (!%p1161_p8)
}
  0x38   : > { %s1968_s21 = smov 64   ;;  %s1970_s22 = smov 4  }
  0x39   : > { %1041 = dma.hbm_to_vmem [thread:$0]  (!%p1586_p11), %s2006_s3, 256, %s294_s17, [#allocation9], %s1968_s21, %s1968_s21, %s1970_s22  }
  0x3a   : > { %p47_p1 = scmp.ge.s32.totalorder %s45_s19, 2  ;;  %s54_s26 = sadd.s32 1, %s1453_s29 }
  0x3b   : > { %p61_p2 = scmp.ne.s32.totalorder %s1453_s29, %s1449_s28  ;;  %p62_p4 = scmp.eq.s32.totalorder %s1465_s10, 0 }
  0x3c   : > { %s2049_s19 = smov (%p47_p1, %s45_s19), 0  ;;  %p2009_p8 = scmp.eq.s32.totalorder %s1556_s11, 1 }
  0x3d   : > { %2008 = sst [smem:[#allocation27_spill]] %s2049_s19  ;;  %p63_p6 = por %p62_p4, %p61_p2 }
  0x3e   : > { %p1626_p10 = por %p2009_p8, %p61_p2  ;;  %s49_s20 = ssub.s32 %s1461_s9, %s2049_s19 }
  0x3f   : > { %p1071_p12 = scmp.lt.s32.totalorder %s1465_s10, 2  ;;  %p52_p0 = scmp.eq.s32.totalorder %s49_s20, 0 }
  0x40   : > { %s2010_s16 = scalar_select %p1626_p10, 1, 0 }
  0x41   : > { %s1973_s12 = sand.u32 1, %s1453_s29   ;;  %s1639_s23 = sshll.u32 %s1461_s9, 6 }
  0x42   : > { %2011 = sst [smem:[#allocation28_spill]] %s2010_s16  ;;  %s1636_s17 = sshll.u32 %s1973_s12, 2 }
  0x43   : > { %s1642_s24 = scalar_select %p52_p0, %s1453_s29, %s54_s26  }
  0x44   : > { %p1644_p3 = pnand %p1071_p12, %p63_p6  ;;  %s352_s22 = sand.u32 1, %s1465_s10  }
  0x45   : > { %2012 = sst [smem:[#allocation29_spill]] %s1642_s24  ;;  %s2014_s1 = sld [smem:[#allocation30_spill]] }
  0x46   : > { %s2013_s21 = scalar_select %p1644_p3, 1, 0 }
  0x47   : > { %s356_s12 = scalar_lea.vmem [#allocation5], %s1636_s17  ;;  %s1470_s26 = smov [#allocation10]  }
  0x48   : > { %s364_s9 = sshll.u32 %s356_s12, 4  ;;  %s1658_s24 = sshll.u32 %s1470_s26, 4  ;;  %s1656_s9 = int_to_ptr.vmem [resolvable:$true] %s364_s9  ;;  %s307_s24 = int_to_ptr.vmem [resolvable:$true] %s1658_s24 }
  0x49   : > { %s1660_s14 = scalar_lea.sflag [#allocation6], %s352_s22  ;;  %p1666_p7 = pneg %p1644_p3 }
  0x4b   : > { %s1653_s20 = scalar_lea.hbm %s2014_s1, %s1639_s23  ;;  %s1170_s10 = scalar_lea.hbm %s2014_s1, 128 }
  0x4c   : > { %s1165_s27 = scalar_lea.hbm %s1653_s20, 64  ;;  %p1171_p2 = scmp.lt.u32.totalorder %s1653_s20, %s2014_s1 }
  0x4d   : > { %p1166_p5 = scmp.ne.s32.totalorder %s1653_s20, %s1165_s27  ;;  %p1172_p4 = scmp.lt.u32.totalorder %s1170_s10, %s1165_s27 }
  0x4e   : > { %s2015_s3 = scalar_select %p1666_p7, 1, 0 }
  0x4f   : > { %p1168_p9 = pnand %p1666_p7, %p1166_p5  ;;  %p1173_p6 = por %p1172_p4, %p1171_p2 }
  0x50   : > { %p1174_p8 = scmp.lt.u32.totalorder %s1165_s27, %s1653_s20 }
  0x51   : > { %p1169_p1 = pneg %p1168_p9 }
  0x52   : > { %p1175_p12 = por %p1174_p8, %p1173_p6 }
  0x54   : > { %p1176_p0 = pnand %p1175_p12, %p1169_p1 }
  0x56   : > { %1179 = shalt.err (!%p1176_p0)
}
  0x57   : > { %s1180_s22 = scalar_lea.vmem %s1656_s9, 64  ;;  %s1471_s19 = smov [#allocation5]  }
  0x58   : > { %p1181_p5 = scmp.ne.s32.totalorder %s1656_s9, %s1180_s22  ;;  %s1185_s12 = sshll.u32 %s1471_s19, 4  ;;  %s1186_s12 = int_to_ptr.vmem [resolvable:$false] %s1185_s12 }
  0x59   : > { %s1187_s8 = scalar_lea.vmem %s1186_s12, 128  ;;  %p1188_p11 = scmp.lt.s32.totalorder %s1656_s9, %s1186_s12 }
  0x5a   : > { %p1183_p9 = pnand %p1181_p5, %p1666_p7  ;;  %p1189_p13 = scmp.lt.s32.totalorder %s1187_s8, %s1180_s22 }
  0x5c   : > { %p1184_p10 = pneg %p1183_p9  ;;  %p1190_p2 = por %p1189_p13, %p1188_p11 }
  0x5e   : > { %p1191_p4 = pnand %p1190_p2, %p1184_p10 }
  0x60   : > { %1194 = shalt.err (!%p1191_p4)
}
  0x61   : > { %1054 = dma.hbm_to_vmem [thread:$0]  (!%p1644_p3), %s1653_s20, 64, %s1656_s9, %s1660_s14  }
  0x62   : > { %s1195_s26 = scalar_lea.hbm %s1959_s4, 256  ;;  %p2016_p11 = scmp.ne.s32.totalorder %s2007_s25, 0 }
  0x63   : > { %p1196_p1 = scmp.ne.s32.totalorder %s1959_s4, %s1195_s26  ;;  %p1202_p6 = scmp.lt.u32.totalorder %s1195_s26, %s1959_s4 }
  0x65   : > { %p1198_p13 = pnand %p1196_p1, %p2016_p11 }
  0x67   : > { %p1199_p10 = pneg %p1198_p13 }
  0x69   : > { %p1204_p8 = pnand %p1202_p6, %p1199_p10 }
  0x6b   : > { %1207 = shalt.err (!%p1204_p8)
}
  0x6c   : > { %s1208_s8 = scalar_lea.vmem %s307_s24, 256  ;;  %p1216_p9 = scmp.lt.s32.totalorder %s307_s24, %s307_s24 }
  0x6d   : > { %p1209_p12 = scmp.ne.s32.totalorder %s307_s24, %s1208_s8  ;;  %p1217_p2 = scmp.lt.s32.totalorder %s1208_s8, %s1208_s8 }
  0x6f   : > { %p1211_p0 = pnand %p1209_p12, %p2016_p11  ;;  %p1218_p4 = por %p1217_p2, %p1216_p9 }
  0x71   : > { %p1212_p5 = pneg %p1211_p0 }
  0x73   : > { %p1219_p3 = pnand %p1218_p4, %p1212_p5 }
  0x75   : > { %1222 = shalt.err (!%p1219_p3)
}
  0x76   : > { %p2017_p1 = scmp.ne.s32.totalorder %s2005_s18, 0  ;;  %s2018_s1 = smov 4  }
  0x77   : > { %s2019_s9 = smov 64   ;;  %s1472_s10 = smov [#allocation11]  }
  0x78   : > { %1044 = dma.hbm_to_vmem [thread:$0]  (!%p2017_p1), %s1959_s4, 256, %s307_s24, [#allocation9], %s2019_s9, %s2019_s9, %s2018_s1  }
  0x79   : > { %s319_s26 = sshll.u32 %s1472_s10, 4  ;;  %s1223_s12 = scalar_lea.hbm %s1960_s5, 256  ;;  %s320_s26 = int_to_ptr.vmem [resolvable:$true] %s319_s26 }
  0x7a   : > { %p1224_p3 = scmp.ne.s32.totalorder %s1960_s5, %s1223_s12  ;;  %p1230_p6 = scmp.lt.u32.totalorder %s1223_s12, %s1960_s5 }
  0x7c   : > { %p1226_p13 = pnand %p1224_p3, %p2016_p11 }
  0x7e   : > { %p1227_p10 = pneg %p1226_p13 }
  0x80   : > { %p1232_p8 = pnand %p1230_p6, %p1227_p10 }
  0x82   : > { %1235 = shalt.err (!%p1232_p8)
}
  0x83   : > { %s1236_s24 = scalar_lea.vmem %s320_s26, 256  ;;  %p1244_p9 = scmp.lt.s32.totalorder %s320_s26, %s320_s26 }
  0x84   : > { %p1237_p12 = scmp.ne.s32.totalorder %s320_s26, %s1236_s24  ;;  %p1245_p2 = scmp.lt.s32.totalorder %s1236_s24, %s1236_s24 }
  0x86   : > { %p1239_p0 = pnand %p1237_p12, %p2016_p11  ;;  %p1246_p4 = por %p1245_p2, %p1244_p9 }
  0x88   : > { %p1240_p5 = pneg %p1239_p0 }
  0x8a   : > { %p1247_p7 = pnand %p1246_p4, %p1240_p5 }
  0x8c   : > { %1250 = shalt.err (!%p1247_p7)
}
  0x8d   : > { %1047 = dma.hbm_to_vmem [thread:$0]  (!%p2017_p1), %s1960_s5, 256, %s320_s26, [#allocation12], %s2019_s9, %s2019_s9, %s2018_s1  }
  0x8e   : > { %s1737_s20 = scalar_lea.hbm %s1955_s0, %s1639_s23  ;;  %s337_s18 = scalar_lea.vmem [#allocation2], %s1636_s17 }
  0x8f   : > { %s345_s27 = sshll.u32 %s337_s18, 4  ;;  %s2020_s10 = sand.u32 1, %s1453_s29   ;;  %s346_s27 = int_to_ptr.vmem [resolvable:$true] %s345_s27 }
  0x90   : > { %s334_s19 = scalar_lea.sflag [#allocation3], %s2020_s10  ;;  %s1251_s22 = scalar_lea.hbm %s1737_s20, 64 }
  0x91   : > { %p1252_p7 = scmp.ne.s32.totalorder %s1737_s20, %s1251_s22  ;;  %p2021_p11 = scmp.ne.s32.totalorder %s2015_s3, 0 }
  0x92   : > { %s1256_s26 = scalar_lea.hbm %s1955_s0, 128  ;;  %p1257_p1 = scmp.lt.u32.totalorder %s1737_s20, %s1955_s0 }
  0x93   : > { %p1254_p3 = pnand %p1252_p7, %p2021_p11  ;;  %p1258_p10 = scmp.lt.u32.totalorder %s1256_s26, %s1251_s22 }
  0x94   : > { %p1260_p8 = scmp.lt.u32.totalorder %s1251_s22, %s1737_s20 }
  0x95   : > { %p1255_p13 = pneg %p1254_p3  ;;  %p1259_p6 = por %p1258_p10, %p1257_p1 }
  0x97   : > { %p1261_p12 = por %p1260_p8, %p1259_p6 }
  0x99   : > { %p1262_p0 = pnand %p1261_p12, %p1255_p13 }
  0x9b   : > { %1265 = shalt.err (!%p1262_p0)
}
  0x9c   : > { %s1266_s24 = scalar_lea.vmem %s346_s27, 64  ;;  %s1473_s6 = smov [#allocation2]  }
  0x9d   : > { %p1267_p5 = scmp.ne.s32.totalorder %s346_s27, %s1266_s24  ;;  %s1271_s7 = sshll.u32 %s1473_s6, 4  ;;  %s1272_s7 = int_to_ptr.vmem [resolvable:$false] %s1271_s7 }
  0x9e   : > { %s1273_s25 = scalar_lea.vmem %s1272_s7, 128  ;;  %p1274_p4 = scmp.lt.s32.totalorder %s346_s27, %s1272_s7 }
  0x9f   : > { %p1269_p9 = pnand %p1267_p5, %p2021_p11  ;;  %p1275_p7 = scmp.lt.s32.totalorder %s1273_s25, %s1266_s24 }
  0xa1   : > { %p1270_p2 = pneg %p1269_p9  ;;  %p1276_p3 = por %p1275_p7, %p1274_p4 }
  0xa3   : > { %p1277_p1 = pnand %p1276_p3, %p1270_p2 }
  0xa5   : > { %1280 = shalt.err (!%p1277_p1)
}
  0xa6   : > { %p2022_p10 = scmp.ne.s32.totalorder %s2013_s21, 0  ;;  %s1763_s10 = scalar_lea.hbm %s1957_s2, %s1639_s23 }
  0xa7   : > { %s375_s22 = scalar_lea.vmem [#allocation7], %s1636_s17  ;;  %s1281_s9 = scalar_lea.hbm %s1763_s10, 64 }
  0xa8   : > { %1051 = dma.hbm_to_vmem [thread:$0]  (!%p2022_p10), %s1737_s20, 64, %s346_s27, %s334_s19  }
  0xa9   : > { %s383_s1 = sshll.u32 %s375_s22, 4  ;;  %p1282_p13 = scmp.ne.s32.totalorder %s1763_s10, %s1281_s9  ;;  %s384_s1 = int_to_ptr.vmem [resolvable:$true] %s383_s1 }
  0xaa   : > { %s1286_s20 = scalar_lea.hbm %s1957_s2, 128  ;;  %p1287_p12 = scmp.lt.u32.totalorder %s1763_s10, %s1957_s2 }
  0xab   : > { %p1284_p6 = pnand %p1282_p13, %p2021_p11  ;;  %p1288_p0 = scmp.lt.u32.totalorder %s1286_s20, %s1281_s9 }
  0xac   : > { %p1290_p9 = scmp.lt.u32.totalorder %s1281_s9, %s1763_s10 }
  0xad   : > { %p1285_p8 = pneg %p1284_p6  ;;  %p1289_p5 = por %p1288_p0, %p1287_p12 }
  0xaf   : > { %p1291_p2 = por %p1290_p9, %p1289_p5 }
  0xb1   : > { %p1292_p4 = pnand %p1291_p2, %p1285_p8 }
  0xb3   : > { %1295 = shalt.err (!%p1292_p4)
}
  0xb4   : > { %s1296_s17 = scalar_lea.vmem %s384_s1, 64  ;;  %s1474_s23 = smov [#allocation7]  }
  0xb5   : > { %p1297_p7 = scmp.ne.s32.totalorder %s384_s1, %s1296_s17  ;;  %s1301_s8 = sshll.u32 %s1474_s23, 4  ;;  %s1302_s8 = int_to_ptr.vmem [resolvable:$false] %s1301_s8 }
  0xb6   : > { %s1303_s24 = scalar_lea.vmem %s1302_s8, 128  ;;  %p1304_p13 = scmp.lt.s32.totalorder %s384_s1, %s1302_s8 }
  0xb7   : > { %p1299_p3 = pnand %p1297_p7, %p2021_p11  ;;  %p1305_p6 = scmp.lt.s32.totalorder %s1303_s24, %s1296_s17 }
  0xb9   : > { %p1300_p1 = pneg %p1299_p3  ;;  %p1306_p10 = por %p1305_p6, %p1304_p13 }
  0xbb   : > { %p1307_p0 = pnand %p1306_p10, %p1300_p1 }
  0xbd   : > { %1310 = shalt.err (!%p1307_p0)
}
  0xbe   : > { %p2023_p12 = scmp.ne.s32.totalorder %s2013_s21, 0  ;;  %p2024_p8 = scmp.ne.s32.totalorder %s2004_s15, 0 }
  0xbf   : > { %s1787_s3 = sand.u32 (!%p2024_p8), 1, %s1449_s28   ;;  %p2025_p11 = scmp.ne.s32.totalorder (!%p2024_p8), %s2001_s13, 0 }
  0xc0   : > { %1057 = dma.hbm_to_vmem [thread:$0]  (!%p2023_p12), %s1763_s10, 64, %s384_s1, %s1660_s14  }
  0xc1   : > { %392 = sbr.rel (%p2024_p8) target bundleno = 501 (0x1f5), region = 44  ;;  %s1790_s6 = sshll.u32 (!%p2024_p8), %s1787_s3, 2 }
  0xc2   : > { %s395_s7 = scalar_lea.sflag (!%p2024_p8), [#allocation3], %s1787_s3  ;;  %s398_s25 = scalar_lea.vmem (!%p2024_p8), [#allocation2], %s1790_s6 }
  0xc8   : > { %1420 = dma.done.wait (%p2025_p11), %s395_s7, 64  }
  0xc9   : > { %1422 = vsyncadd (%p2025_p11), %s395_s7, 4294967232  ;;  %s403_s14 = sand.u32 1, %s1556_s11   ;;  %s407_s21 = scalar_lea.vmem [#allocation5], %s1790_s6 }
  0xca   : > { %s404_s15 = scalar_lea.sflag [#allocation6], %s403_s14 }
  0xcb   : > { %1424 = dma.done.wait (%p2025_p11), %s404_s15, 128  }
  0xcc   : > { %1426 = vsyncadd (%p2025_p11), %s404_s15, 4294967168  ;;  %s416_s16 = scalar_lea.vmem [#allocation7], %s1790_s6  ;;  %p2026_p10 = scmp.eq.s32.totalorder %s1556_s11, 0 }
  0xce   : > { %1428 = dma.done.wait (%p2026_p10), [#allocation9], 512   ;;  %p2027_p5 = pmov %p2026_p10 }
  0xd0   : > { %1430 = vsyncadd (%p2027_p5), [#allocation9], 4294966784  ;;  %p2028_p9 = pmov %p2027_p5 }
  0xd1   : > { %p2029_p2 = pmov %p2027_p5 }
  0xd2   : > { %1432 = dma.done.wait (%p2028_p9), [#allocation12], 256  }
  0xd3   : > { %1434 = vsyncadd (%p2029_p2), [#allocation12], 4294967040  ;;  %v1475_v0 = vmov 0.0   ;;  %vm1476_vm0 = vmmov 0   ;;  %v1131_v1 = vld [vmem:[#allocation8] sm:$0xff]   ;;  %v1132_v2 = vld [vmem:[#allocation8 + $0x8] sm:$0xff]  }
  0xd4   : > { %990 = vmatprep.subr.bf16.mxu0 %v1475_v0  ;;  %998 = vmatprep.subr.bf16.mxu1 %v1475_v0  ;;  %v1133_v3 = vld [vmem:[#allocation10] sm:$0xff]   ;;  %v1135_v4 = vld [vmem:[#allocation10 + $0x8] sm:$0xff]   ;;  %v482_v5 = vld [vmem:[%s398_s25] sm:$0xf]  ;;  %vm499_vm1 = vcmask 261120   ;;  %s1821_s13 = sshll.u32 %s1457_s30, 6 }
  0xd5   : > { %994 = vmatprep.mubr.msk.bf16.mxu0 %vm1476_vm0, %v1475_v0  ;;  %1002 = vmatprep.mubr.msk.bf16.mxu1 %vm1476_vm0, %v1475_v0  ;;  %v1134_v6 = vld [vmem:[#allocation11] sm:$0xff]   ;;  %v547_v7 = vld [vmem:[%s407_s21] sm:$0xf]  ;;  %v1136_v8 = vld [vmem:[#allocation11 + $0x8] sm:$0xff]   ;;  %s473_s18 = scalar_lea.vmem [#allocation14], %s1790_s6  ;;  %s466_s22 = scalar_lea.vmem [#allocation13], %s1790_s6 }
  0xd6   : > { %991 = vmatpush3.bf16.msra.mxu0 %v1131_v1  ;;  %999 = vmatpush3.bf16.msra.mxu1 %v1133_v3  ;;  %v609_v9 = vld [vmem:[%s416_s16] sm:$0xf]  ;;  %s710_s10 = sshll.u32 %s473_s18, 4  ;;  %s696_s1 = sshll.u32 %s466_s22, 4  ;;  %vm545_vm2 = vcmask 257024   ;;  %s1831_s10 = int_to_ptr.vmem [resolvable:$true] %s710_s10  ;;  %s1839_s1 = int_to_ptr.vmem [resolvable:$true] %s696_s1 }
  0xd7   : > { %992 = vmatprep.subr.bf16.mxu0 %v1475_v0  ;;  %1000 = vmatprep.subr.bf16.mxu1 %v1475_v0  ;;  %s2030_s12 = sld [smem:[#allocation33_spill]]  ;;  %s2032_s17 = sld [smem:[#allocation32_spill]] }
  0xd8   : > { %s2031_s20 = sld [smem:[#allocation28_spill]]  ;;  %s480_s8 = scalar_lea.vmem [#allocation16], %s1790_s6 }
  0xd9   : > { %s1846_s24 = sshll.u32 %s480_s8, 4  ;;  %s1850_s7 = scalar_lea.sflag [#allocation15], %s403_s14  ;;  %s1903_s24 = int_to_ptr.vmem [resolvable:$true] %s1846_s24 }
  0xda   : > { %993 = vmatpush3.bf16.msra.mxu0 %v1132_v2  ;;  %1001 = vmatpush3.bf16.msra.mxu1 %v1135_v4  ;;  %s1311_s25 = scalar_lea.vmem %s1831_s10, 64  ;;  %s1477_s15 = smov [#allocation14]  }
  0xdb   : > { %1006 = vmatprep.subr.bf16.mxu0 %v1475_v0  ;;  %p1312_p4 = scmp.ne.s32.totalorder %s1831_s10, %s1311_s25  ;;  %s1315_s21 = sshll.u32 %s1477_s15, 4  ;;  %s1316_s21 = int_to_ptr.vmem [resolvable:$false] %s1315_s21 }
  0xdc   : > { %s1317_s16 = scalar_lea.vmem %s1316_s21, 128  ;;  %p1318_p13 = scmp.lt.s32.totalorder %s1831_s10, %s1316_s21 }
  0xdd   : > { %995 = vmatmul.mubr.msk.bf16.vlgmr.msra.gmra.mrb[0].mxu0 %vm499_vm1, %v482_v5  ;;  %1003 = vmatmul.mubr.msk.bf16.vlgmr.msra.gmra.mrb[0].mxu1 %vm499_vm1, %v547_v7  ;;  %s1829_s30 = scalar_lea.hbm %s2030_s12, %s1821_s13  ;;  %s1837_s23 = scalar_lea.hbm %s2032_s17, %s1821_s13 }
  0xde   : > { %1007 = vmatpush3.bf16.msra.mxu0 %v1134_v6  ;;  %1010 = vmatprep.mubr.msk.bf16.mxu0 %vm1476_vm0, %v1475_v0  ;;  %p2033_p7 = scmp.ne.s32.totalorder %s2031_s20, 0  ;;  %p1319_p6 = scmp.lt.s32.totalorder %s1317_s16, %s1311_s25 }
  0xdf   : > { %1008 = vmatprep.subr.bf16.mxu0 %v1475_v0 }
  0xe0   : > { %p1313_p3 = pnand %p1312_p4, %p2033_p7  ;;  %p1320_p0 = por %p1319_p6, %p1318_p13 }
  0xe2   : > { %1009 = vmatpush3.bf16.msra.mxu0 %v1136_v8  ;;  %p1314_p1 = pneg %p1313_p3 }
  0xe4   : > { %p1321_p12 = pnand %p1320_p0, %p1314_p1 }
  0xe5   : > { %1011 = vmatmul.mubr.msk.bf16.vlgmr.msra.gmra.mrb[4].mxu0 %vm499_vm1, %v609_v9 }
 0x1b0   : > { %v537_v10 = vpop.f32.mrb[0].mxu0  ;;  %v601_v14 = vpop.f32.mrb[0].mxu1 }
 0x1b1   : > { %v543_v11 = vmul.f32 0.35355338, %v537_v10  ;;  %v996_v12 = vpop.f32.mrb[1].mxu0  ;;  %v607_v17 = vpack.c.bf16 %v601_v14, %v601_v14  ;;  %v1004_v18 = vpop.f32.mrb[1].mxu1 }
 0x1b2   : > { %v540_v13 = vpop.f32.mrb[2].mxu0  ;;  %v604_v19 = vpop.f32.mrb[2].mxu1 }
 0x1b3   : > { %v544_v15 = vpack.c.bf16 %v543_v11, %v543_v11  ;;  %v997_v16 = vpop.f32.mrb[3].mxu0  ;;  %v1005_v20 = vpop.f32.mrb[3].mxu1  ;;  %608 = vst.msk [vmem:[%s473_s18] sm:$0xf] %vm545_vm2, %v607_v17 }
 0x1b5   : > { %546 = vst.msk [vmem:[%s466_s22] sm:$0xf] %vm545_vm2, %v544_v15 }
 0x1b6   : > { %1324 = shalt.err (!%p1321_p12)
}
 0x1b7   : > { %s1325_s11 = scalar_lea.hbm %s1829_s30, 64  ;;  %s1329_s22 = scalar_lea.hbm %s2030_s12, 128 }
 0x1b8   : > { %p1326_p8 = scmp.ne.s32.totalorder %s1829_s30, %s1325_s11  ;;  %p1330_p5 = scmp.lt.u32.totalorder %s1829_s30, %s2030_s12 }
 0x1b9   : > { %p1331_p9 = scmp.lt.u32.totalorder %s1329_s22, %s1325_s11  ;;  %p1333_p4 = scmp.lt.u32.totalorder %s1325_s11, %s1829_s30 }
 0x1ba   : > { %p1327_p11 = pnand %p1326_p8, %p2033_p7 }
 0x1bb   : > { %p1332_p2 = por %p1331_p9, %p1330_p5 }
 0x1bc   : > { %p1328_p10 = pneg %p1327_p11 }
 0x1bd   : > { %p1334_p3 = por %p1333_p4, %p1332_p2 }
 0x1bf   : > { %p1335_p1 = pnand %p1334_p3, %p1328_p10 }
 0x1c1   : > { %1338 = shalt.err (!%p1335_p1)
}
 0x1c2   : > { %1033 = dma.vmem_to_hbm [thread:$0]  (%p2033_p7), %s1831_s10, 64, %s1829_s30, %s1850_s7  }
 0x1c3   : > { %s672_s27 = scalar_lea.sflag [#allocation4], %s1787_s3  ;;  %s1339_s19 = scalar_lea.vmem %s1839_s1, 64 }
 0x1c4   : > { %p1340_p13 = scmp.ne.s32.totalorder %s1839_s1, %s1339_s19  ;;  %s1478_s25 = smov [#allocation13]  }
 0x1c5   : > { %s1343_s15 = sshll.u32 %s1478_s25, 4  ;;  %s1344_s15 = int_to_ptr.vmem [resolvable:$false] %s1343_s15 }
 0x1c6   : > { %p1341_p6 = pnand %p1340_p13, %p2033_p7  ;;  %s1345_s21 = scalar_lea.vmem %s1344_s15, 128 }
 0x1c7   : > { %p1346_p12 = scmp.lt.s32.totalorder %s1839_s1, %s1344_s15  ;;  %p1347_p8 = scmp.lt.s32.totalorder %s1345_s21, %s1339_s19 }
 0x1c8   : > { %p1342_p0 = pneg %p1341_p6 }
 0x1c9   : > { %p1348_p11 = por %p1347_p8, %p1346_p12 }
 0x1cb   : > { %p1349_p10 = pnand %p1348_p11, %p1342_p0 }
 0x1cd   : > { %1352 = shalt.err (!%p1349_p10)
}
 0x1ce   : > { %s1353_s3 = scalar_lea.hbm %s1837_s23, 64  ;;  %s1357_s16 = scalar_lea.hbm %s2032_s17, 128 }
 0x1cf   : > { %p1354_p5 = scmp.ne.s32.totalorder %s1837_s23, %s1353_s3  ;;  %p1358_p4 = scmp.lt.u32.totalorder %s1837_s23, %s2032_s17 }
 0x1d0   : > { %p1359_p3 = scmp.lt.u32.totalorder %s1357_s16, %s1353_s3  ;;  %p1361_p13 = scmp.lt.u32.totalorder %s1353_s3, %s1837_s23 }
 0x1d1   : > { %p1355_p9 = pnand %p1354_p5, %p2033_p7 }
 0x1d2   : > { %p1360_p1 = por %p1359_p3, %p1358_p4 }
 0x1d3   : > { %p1356_p2 = pneg %p1355_p9 }
 0x1d4   : > { %p1362_p6 = por %p1361_p13, %p1360_p1 }
 0x1d6   : > { %p1363_p0 = pnand %p1362_p6, %p1356_p2 }
 0x1d8   : > { %1366 = shalt.err (!%p1363_p0)
}
 0x1d9   : > { %1032 = dma.vmem_to_hbm [thread:$0]  (%p2033_p7), %s1839_s1, 64, %s1837_s23, %s672_s27   ;;  %v663_v21 = vpop.f32.mrb[4].mxu0 }
 0x1da   : > { %v669_v22 = vpack.c.bf16 %v663_v21, %v663_v21  ;;  %v1012_v23 = vpop.f32.mrb[5].mxu0  ;;  %s2034_s9 = sld [smem:[#allocation34_spill]]  ;;  %s1367_s25 = scalar_lea.vmem %s1903_s24, 64 }
 0x1db   : > { %v666_v24 = vpop.f32.mrb[6].mxu0  ;;  %p1368_p12 = scmp.ne.s32.totalorder %s1903_s24, %s1367_s25  ;;  %s1479_s1 = smov [#allocation16]  }
 0x1dc   : > { %v1013_v25 = vpop.f32.mrb[7].mxu0  ;;  %670 = vst.msk [vmem:[%s480_s8] sm:$0xf] %vm545_vm2, %v669_v22  ;;  %s1371_s23 = sshll.u32 %s1479_s1, 4  ;;  %s1372_s23 = int_to_ptr.vmem [resolvable:$false] %s1371_s23 }
 0x1dd   : > { %p1369_p8 = pnand %p1368_p12, %p2033_p7  ;;  %p1374_p10 = scmp.lt.s32.totalorder %s1903_s24, %s1372_s23 }
 0x1df   : > { %p1370_p11 = pneg %p1369_p8 }
 0x1e0   : > { %s2035_s26 = smov %s2034_s9  ;;  %s1900_s19 = scalar_lea.hbm %s2034_s9, %s1821_s13 }
 0x1e1   : > { %s1373_s13 = scalar_lea.vmem %s1372_s23, 128 }
 0x1e2   : > { %p1375_p5 = scmp.lt.s32.totalorder %s1373_s13, %s1367_s25 }
 0x1e4   : > { %p1376_p9 = por %p1375_p5, %p1374_p10 }
 0x1e6   : > { %p1377_p2 = pnand %p1376_p9, %p1370_p11 }
 0x1e8   : > { %1380 = shalt.err (!%p1377_p2)
}
 0x1e9   : > { %s1381_s6 = scalar_lea.hbm %s1900_s19, 64  ;;  %s1385_s15 = scalar_lea.hbm %s2035_s26, 128 }
 0x1ea   : > { %p1382_p4 = scmp.ne.s32.totalorder %s1900_s19, %s1381_s6  ;;  %p1386_p13 = scmp.lt.u32.totalorder %s1900_s19, %s2035_s26 }
 0x1eb   : > { %p1387_p6 = scmp.lt.u32.totalorder %s1385_s15, %s1381_s6  ;;  %p1389_p12 = scmp.lt.u32.totalorder %s1381_s6, %s1900_s19 }
 0x1ec   : > { %p1383_p3 = pnand %p1382_p4, %p2033_p7 }
 0x1ed   : > { %p1388_p0 = por %p1387_p6, %p1386_p13 }
 0x1ee   : > { %p1384_p1 = pneg %p1383_p3 }
 0x1ef   : > { %p1390_p8 = por %p1389_p12, %p1388_p0 }
 0x1f1   : > { %p1391_p11 = pnand %p1390_p8, %p1384_p1 }
 0x1f3   : > { %1394 = shalt.err (!%p1391_p11)
}
 0x1f4   : > { %1034 = dma.vmem_to_hbm [thread:$0]  (%p2033_p7), %s1903_s24, 64, %s1900_s19, %s1850_s7  }
 0x1f5 PF: > { %s2036_s10 = sld [smem:[#allocation23_spill]]  ;;  %s2037_s30 = sld [smem:[#allocation26_spill]] }
 0x1f6   : > { %s2038_s16 = sld [smem:[#allocation25_spill]] }
 0x1fb   : > { %s736_s11 = sand.u32 1, %s2036_s10   ;;  %p2039_p10 = scmp.ne.s32.totalorder %s2037_s30, 0 }
 0x1fc   : > { %p2040_p5 = scmp.ge.s32.totalorder %s2038_s16, 2  ;;  %s737_s14 = scalar_lea.sflag [#allocation4], %s736_s11 }
 0x1fe   : > { %p1059_p9 = pnand %p2040_p5, %p2039_p10 }
 0x200   : > { %1436 = dma.done.wait (!%p1059_p9), %s737_s14, 64  }
 0x201   : > { %1438 = vsyncadd (!%p1059_p9), %s737_s14, 4294967232  ;;  %s2041_s18 = sadd.s32 4294967294, %s2038_s16  }
 0x202   : > { %s745_s22 = sand.u32 1, %s2041_s18  }
 0x203   : > { %s746_s9 = scalar_lea.sflag [#allocation15], %s745_s22 }
 0x204   : > { %1440 = dma.done.wait (!%p1059_p9), %s746_s9, 128  }
 0x205   : > { %1442 = vsyncadd (!%p1059_p9), %s746_s9, 4294967168  ;;  %s33_s10 = sadd.s32 1, %s2038_s16   ;;  %s2042_s20 = sld [smem:[#allocation29_spill]] }
 0x206   : > { %p30_p7 = scmp.ge.s32.totalorder %s33_s10, 4   ;;  %s2043_s30 = sld [smem:[#allocation24_spill]] }
 0x207   : > { %s2044_s9 = sld [smem:[#allocation27_spill]]  ;;  %s2045_s27 = smov %s1449_s28 }
 0x208   : > { %s2046_s28 = smov %s1453_s29  ;;  %32 = sbr.rel (!%p30_p7) target bundleno = 18 (0x12), region = 157 }
 0x20b   : > { %s2047_s29 = smov %s2042_s20 }
 0x20f   :  { %760 = vsyncpa [#allocation3], 1 }
 0x210   :  { %762 = vsyncpa [#allocation3 + $0x1], 1 }
 0x211   :  { %763 = vsyncpa [#allocation6], 1 }
 0x212   :  { %765 = vsyncpa [#allocation6 + $0x1], 1 }
 0x213   :  { %766 = vsyncpa [#allocation9], 1 }
 0x214   :  { %767 = vsyncpa [#allocation12], 1 }
 0x215   :  { %768 = vsyncpa [#allocation4], 1 }
 0x216   :  { %770 = vsyncpa [#allocation4 + $0x1], 1 }
 0x217   :  { %771 = vsyncpa [#allocation15], 1 }
 0x218   :  { %773 = vsyncpa [#allocation15 + $0x1], 1 }

// kernel: multi_head_attention.3
= control target key start
LH: loop header
LB: loop body
LE: loop exit
PB: predicated region body
PF: predicated region fallthrough
CT: control target
= control target key end

     0   :  { %s2749_s0 = inlined_call_operand.hbm [shape: bf16[2,4,8,8], index: 0, kind: input, shape index: {}]   ;;  %s2750_s1 = inlined_call_operand.hbm [shape: bf16[2,4,8,8], index: 1, kind: input, shape index: {}]   ;;  %s2751_s2 = inlined_call_operand.hbm [shape: bf16[2,4,8,8], index: 2, kind: input, shape index: {}]   ;;  %s2752_s3 = inlined_call_operand.hbm [shape: s8[2,1,8,8], index: 3, kind: input, shape index: {}]   ;;  %s2753_s4 = inlined_call_operand.hbm [shape: f32[2,8,32], index: 4, kind: input, shape index: {}]   ;;  %s2754_s5 = inlined_call_operand.hbm [shape: bf16[32,32], index: 5, kind: input, shape index: {}]   ;;  %s2755_s6 = inlined_call_operand.hbm [shape: f32[1,32], index: 6, kind: input, shape index: {}]   ;;  %s2756_s7 = inlined_call_operand.hbm [shape: f32[1,32], index: 7, kind: input, shape index: {}]   ;;  %s2757_s8 = inlined_call_operand.hbm [shape: f32[2,8,32], index: 8, kind: output, shape index: {}]  }
   0x1   :  { %2790 = sst [smem:[#allocation37_spill]] %s2750_s1 }
   0x2   :  { %2791 = sst [smem:[#allocation38_spill]] %s2752_s3 }
   0x3   :  { %2792 = sst [smem:[#allocation39_spill]] %s2754_s5 }
   0x4   :  { %2793 = sst [smem:[#allocation40_spill]] %s2757_s8 }
   0x5   :  { %13 = vsyncpa [#allocation6], 0 }
   0x6   :  { %15 = vsyncpa [#allocation6 + $0x1], 0 }
   0x7   :  { %16 = vsyncpa [#allocation9], 0 }
   0x8   :  { %18 = vsyncpa [#allocation9 + $0x1], 0 }
   0x9   :  { %19 = vsyncpa [#allocation12], 0 }
   0xa   :  { %21 = vsyncpa [#allocation12 + $0x1], 0 }
   0xb   :  { %22 = vsyncpa [#allocation15], 0 }
   0xc   :  { %23 = vsyncpa [#allocation18], 0 }
   0xd   :  { %24 = vsyncpa [#allocation7], 0 }
   0xe   :  { %26 = vsyncpa [#allocation7 + $0x1], 0  ;;  %s2146_s27 = smov 0   ;;  %s2148_s28 = smov 0  }
   0xf   :  { %s2150_s29 = smov 0   ;;  %s2152_s30 = smov 0  }
  0x10   :  { %s2154_s9 = smov 0   ;;  %s2156_s10 = smov 0  }
  0x11 LB: > { %2794 = sst [smem:[#allocation26_spill]] %s2061_s27  ;;  %s2177_s11 = sadd.s32 4294967295, %s2081_s10   ;;  %s2081_s10 = sphi %s2156_s10, %s32_s10   ;;  %s2077_s9 = sphi %s2154_s9, %s2855_s9   ;;  %s2073_s30 = sphi %s2152_s30, %s2854_s30   ;;  %s2069_s29 = sphi %s2150_s29, %s2852_s29   ;;  %s2065_s28 = sphi %s2148_s28, %s2851_s28   ;;  %s2061_s27 = sphi %s2146_s27, %s2850_s27  }
  0x12   : > { %2795 = sst [smem:[#allocation27_spill]] %s2065_s28  ;;  %s1473_s12 = sadd.s32 4294967294, %s2081_s10  }
  0x13   : > { %2796 = sst [smem:[#allocation28_spill]] %s2069_s29  ;;  %p67_p0 = scmp.ne.s32.totalorder %s2069_s29, %s2065_s28 }
  0x14   : > { %2797 = sst [smem:[#allocation29_spill]] %s2073_s30  ;;  %p68_p1 = scmp.eq.s32.totalorder %s2081_s10, 0 }
  0x15   : > { %2798 = sst [smem:[#allocation30_spill]] %s2081_s10  ;;  %p73_p2 = scmp.ne.s32.totalorder %s2065_s28, %s2061_s27 }
  0x16   : > { %2799 = sst [smem:[#allocation31_spill]] %s2177_s11  ;;  %p2761_p3 = scmp.eq.s32.totalorder %s2177_s11, 0 }
  0x17   : > { %p276_p4 = scmp.eq.s32.totalorder %s2177_s11, 1  ;;  %p2188_p5 = por %p68_p1, %p67_p0 }
  0x18   : > { %p282_p6 = scmp.eq.s32.totalorder %s1473_s12, 1  ;;  %p2194_p7 = por %p2761_p3, %p73_p2 }
  0x19   : > { %p2198_p8 = por %p276_p4, %p67_p0  ;;  %p1474_p10 = scmp.ge.s32.totalorder %s2081_s10, 1 }
  0x1a   : > { %s2801_s15 = scalar_select %p2194_p7, 1, 0 }
  0x1b   : > { %s2803_s16 = scalar_select %p2198_p8, 1, 0 }
  0x1c   : > { %2802 = sst [smem:[#allocation32_spill]] %s2801_s15  ;;  %p2202_p9 = por %p282_p6, %p73_p2 }
  0x1d   : > { %2804 = sst [smem:[#allocation33_spill]] %s2803_s16  ;;  %p289_p11 = scmp.lt.s32.totalorder %s2081_s10, 3 }
  0x1e   : > { %s2805_s17 = scalar_select %p2202_p9, 1, 0 }
  0x1f   : > { %p2208_p12 = pnand %p1474_p10, %p289_p11  ;;  %s2083_s19 = smov [#allocation14]  }
  0x20   : > { %2806 = sst [smem:[#allocation34_spill]] %s2805_s17  ;;  %s301_s20 = sshll.u32 %s2083_s19, 4  ;;  %s2212_s20 = int_to_ptr.vmem [resolvable:$true] %s301_s20 }
  0x21   : > { %s2807_s18 = scalar_select %p2208_p12, 1, 0 }
  0x22   : > { %p1621_p13 = pneg %p2208_p12  ;;  %s51_s22 = sadd.s32 1, %s2077_s9 }
  0x23   : > { %s2226_s23 = sand.u32 1, %s2069_s29   ;;  %p2228_p4 = scmp.ge.s32.totalorder %s51_s22, 2 }
  0x24   : > { %p2220_p2 = pnand %p1621_p13, %p2761_p3  ;;  %s2810_s5 = sld [smem:[#allocation39_spill]] }
  0x26   : > { %s2808_s21 = scalar_select %p2220_p2, 1, 0 }
  0x27   : > { %p2240_p10 = pneg %p2220_p2 }
  0x29   : > { %s2811_s17 = scalar_select %p2240_p10, 1, 0 }
  0x2a   : > { %s1749_s12 = scalar_lea.hbm %s2810_s5, 256 }
  0x2b   : > { %p1750_p6 = scmp.ne.s32.totalorder %s2810_s5, %s1749_s12  ;;  %p1756_p0 = scmp.lt.u32.totalorder %s1749_s12, %s2810_s5 }
  0x2d   : > { %p1752_p11 = pnand %p2240_p10, %p1750_p6 }
  0x2f   : > { %p1753_p13 = pneg %p1752_p11 }
  0x31   : > { %p1758_p3 = pnand %p1756_p0, %p1753_p13 }
  0x33   : > { %1761 = shalt.err (!%p1758_p3)
}
  0x34   : > { %s1762_s13 = scalar_lea.vmem %s2212_s20, 256  ;;  %p1770_p7 = scmp.lt.s32.totalorder %s2212_s20, %s2212_s20 }
  0x35   : > { %p1763_p1 = scmp.ne.s32.totalorder %s2212_s20, %s1762_s13  ;;  %p1771_p12 = scmp.lt.s32.totalorder %s1762_s13, %s1762_s13 }
  0x37   : > { %p1765_p9 = pnand %p1763_p1, %p2240_p10  ;;  %p1772_p6 = por %p1771_p12, %p1770_p7 }
  0x39   : > { %p1766_p8 = pneg %p1765_p9 }
  0x3b   : > { %p1773_p11 = pnand %p1772_p6, %p1766_p8 }
  0x3d   : > { %1776 = shalt.err (!%p1773_p11)
}
  0x3e   : > { %s2767_s25 = smov 64   ;;  %s2769_s8 = smov 4  }
  0x3f   : > { %1624 = dma.hbm_to_vmem [thread:$0]  (!%p2220_p2), %s2810_s5, 256, %s2212_s20, [#allocation15], %s2767_s25, %s2767_s25, %s2769_s8  }
  0x40   : > { %s2857_s22 = smov (%p2228_p4, %s51_s22), 0  ;;  %s2269_s12 = sshll.u32 %s2226_s23, 4 }
  0x41   : > { %2812 = sst [smem:[#allocation35_spill]] %s2857_s22  ;;  %s2272_s19 = sshll.u32 %s2077_s9, 8 }
  0x42   : > { %s55_s13 = ssub.s32 %s2077_s9, %s2857_s22  ;;  %p2813_p3 = scmp.lt.s32.totalorder %s2081_s10, 2 }
  0x43   : > { %p58_p8 = scmp.eq.s32.totalorder %s55_s13, 0  ;;  %s2772_s20 = sand.u32 1, %s2081_s10  }
  0x44   : > { %p2280_p7 = pnand %p2813_p3, %p2188_p5  ;;  %s2815_s24 = sadd.s32 1, %s2069_s29 }
  0x45   : > { %s2288_s27 = scalar_select %p58_p8, %s2069_s29, %s2815_s24  }
  0x46   : > { %s2814_s16 = scalar_select %p2280_p7, 1, 0 }
  0x47   : > { %2816 = sst [smem:[#allocation36_spill]] %s2288_s27  ;;  %s2817_s1 = sld [smem:[#allocation37_spill]] }
  0x48   : > { %s363_s14 = scalar_lea.vmem [#allocation8], %s2269_s12  ;;  %s2302_s13 = scalar_lea.sflag [#allocation9], %s2772_s20 }
  0x49   : > { %s371_s5 = sshll.u32 %s363_s14, 4  ;;  %p2308_p9 = pneg %p2280_p7  ;;  %s2297_s5 = int_to_ptr.vmem [resolvable:$true] %s371_s5 }
  0x4b   : > { %s2818_s24 = scalar_select %p2308_p9, 1, 0 }
  0x4d   : > { %s2294_s8 = scalar_lea.hbm %s2817_s1, %s2272_s19  ;;  %s1782_s14 = scalar_lea.hbm %s2817_s1, 512 }
  0x4e   : > { %s1777_s30 = scalar_lea.hbm %s2294_s8, 256  ;;  %p1783_p1 = scmp.lt.u32.totalorder %s2294_s8, %s2817_s1 }
  0x4f   : > { %p1778_p5 = scmp.ne.s32.totalorder %s2294_s8, %s1777_s30  ;;  %p1784_p4 = scmp.lt.u32.totalorder %s1782_s14, %s1777_s30 }
  0x50   : > { %p1786_p6 = scmp.lt.u32.totalorder %s1777_s30, %s2294_s8 }
  0x51   : > { %p1780_p12 = pnand %p2308_p9, %p1778_p5  ;;  %p1785_p13 = por %p1784_p4, %p1783_p1 }
  0x53   : > { %p1781_p0 = pneg %p1780_p12  ;;  %p1787_p11 = por %p1786_p6, %p1785_p13 }
  0x55   : > { %p1788_p3 = pnand %p1787_p11, %p1781_p0 }
  0x57   : > { %1791 = shalt.err (!%p1788_p3)
}
  0x58   : > { %s1792_s20 = scalar_lea.vmem %s2297_s5, 256  ;;  %s2086_s25 = smov [#allocation8]  }
  0x59   : > { %p1793_p8 = scmp.ne.s32.totalorder %s2297_s5, %s1792_s20  ;;  %s1797_s26 = sshll.u32 %s2086_s25, 4  ;;  %s1798_s26 = int_to_ptr.vmem [resolvable:$false] %s1797_s26 }
  0x5a   : > { %s1799_s22 = scalar_lea.vmem %s1798_s26, 512  ;;  %p1800_p2 = scmp.lt.s32.totalorder %s2297_s5, %s1798_s26 }
  0x5b   : > { %p1795_p5 = pnand %p1793_p8, %p2308_p9  ;;  %p1801_p10 = scmp.lt.s32.totalorder %s1799_s22, %s1792_s20 }
  0x5d   : > { %p1796_p12 = pneg %p1795_p5  ;;  %p1802_p1 = por %p1801_p10, %p1800_p2 }
  0x5f   : > { %p1803_p4 = pnand %p1802_p1, %p1796_p12 }
  0x61   : > { %1806 = shalt.err (!%p1803_p4)
}
  0x62   : > { %s2819_s30 = smov 4   ;;  %s2820_s27 = smov 64  }
  0x63   : > { %1637 = dma.hbm_to_vmem [thread:$0]  (!%p2280_p7), %s2294_s8, 256, %s2297_s5, %s2302_s13, %s2820_s27, %s2820_s27, %s2819_s30  }
  0x64   : > { %s1489_s14 = sshll.u32 %s2077_s9, 5  ;;  %s2821_s3 = sld [smem:[#allocation38_spill]] }
  0x65   : > { %s2822_s22 = sshll.u32 %s2226_s23, 1  ;;  %s2823_s11 = sand.u32 1, %s2081_s10  }
  0x66   : > { %s407_s1 = scalar_lea.vmem [#allocation11], %s2822_s22  ;;  %s2345_s15 = scalar_lea.sflag [#allocation12], %s2823_s11 }
  0x67   : > { %s416_s29 = sshll.u32 %s407_s1, 4  ;;  %s417_s29 = int_to_ptr.vmem [resolvable:$true] %s416_s29 }
  0x6a   : > { %s2339_s20 = scalar_lea.hbm %s2821_s3, %s1489_s14  ;;  %s1812_s14 = scalar_lea.hbm %s2821_s3, 64 }
  0x6b   : > { %s1807_s28 = scalar_lea.hbm %s2339_s20, 32  ;;  %p1813_p13 = scmp.lt.u32.totalorder %s2339_s20, %s2821_s3 }
  0x6c   : > { %p1808_p2 = scmp.ne.s32.totalorder %s2339_s20, %s1807_s28  ;;  %p1814_p6 = scmp.lt.u32.totalorder %s1812_s14, %s1807_s28 }
  0x6d   : > { %p1816_p3 = scmp.lt.u32.totalorder %s1807_s28, %s2339_s20 }
  0x6e   : > { %p1810_p10 = pnand %p1808_p2, %p2308_p9  ;;  %p1815_p11 = por %p1814_p6, %p1813_p13 }
  0x70   : > { %p1811_p0 = pneg %p1810_p10  ;;  %p1817_p8 = por %p1816_p3, %p1815_p11 }
  0x72   : > { %p1818_p5 = pnand %p1817_p8, %p1811_p0 }
  0x74   : > { %1821 = shalt.err (!%p1818_p5)
}
  0x75   : > { %s1822_s1 = scalar_lea.vmem %s417_s29, 32  ;;  %s2087_s11 = smov [#allocation11]  }
  0x76   : > { %p1823_p12 = scmp.ne.s32.totalorder %s417_s29, %s1822_s1  ;;  %s1827_s22 = sshll.u32 %s2087_s11, 4  ;;  %s1828_s22 = int_to_ptr.vmem [resolvable:$false] %s1827_s22 }
  0x77   : > { %s1829_s5 = scalar_lea.vmem %s1828_s22, 64  ;;  %p1830_p2 = scmp.lt.s32.totalorder %s417_s29, %s1828_s22 }
  0x78   : > { %p1825_p1 = pnand %p1823_p12, %p2308_p9  ;;  %p1831_p10 = scmp.lt.s32.totalorder %s1829_s5, %s1822_s1 }
  0x7a   : > { %p1826_p4 = pneg %p1825_p1  ;;  %p1832_p7 = por %p1831_p10, %p1830_p2 }
  0x7c   : > { %p1833_p6 = pnand %p1832_p7, %p1826_p4 }
  0x7e   : > { %1836 = shalt.err (!%p1833_p6)
}
  0x7f   : > { %p2824_p13 = scmp.ne.s32.totalorder %s2814_s16, 0  ;;  %s2088_s28 = smov [#allocation16]  }
  0x80   : > { %s315_s8 = sshll.u32 %s2088_s28, 4  ;;  %s2089_s14 = smov [#allocation17]   ;;  %s316_s8 = int_to_ptr.vmem [resolvable:$true] %s315_s8 }
  0x81   : > { %1643 = dma.hbm_to_vmem [thread:$0]  (!%p2824_p13), %s2339_s20, 32, %s417_s29, %s2345_s15  }
  0x82   : > { %s326_s25 = sshll.u32 %s2089_s14, 4  ;;  %s1837_s3 = scalar_lea.hbm %s2755_s6, 16  ;;  %s327_s25 = int_to_ptr.vmem [resolvable:$true] %s326_s25 }
  0x83   : > { %p1838_p7 = scmp.ne.s32.totalorder %s2755_s6, %s1837_s3  ;;  %p2825_p0 = scmp.ne.s32.totalorder %s2811_s17, 0 }
  0x84   : > { %p1844_p8 = scmp.lt.u32.totalorder %s1837_s3, %s2755_s6 }
  0x85   : > { %p1840_p11 = pnand %p1838_p7, %p2825_p0 }
  0x87   : > { %p1841_p3 = pneg %p1840_p11 }
  0x89   : > { %p1846_p5 = pnand %p1844_p8, %p1841_p3 }
  0x8b   : > { %1849 = shalt.err (!%p1846_p5)
}
  0x8c   : > { %s1850_s29 = scalar_lea.vmem %s316_s8, 16  ;;  %s1857_s20 = scalar_lea.vmem %s316_s8, 32 }
  0x8d   : > { %p1851_p12 = scmp.ne.s32.totalorder %s316_s8, %s1850_s29  ;;  %p1858_p2 = scmp.lt.s32.totalorder %s316_s8, %s316_s8 }
  0x8e   : > { %p1859_p10 = scmp.lt.s32.totalorder %s1857_s20, %s1850_s29 }
  0x8f   : > { %p1853_p1 = pnand %p1851_p12, %p2825_p0 }
  0x90   : > { %p1860_p6 = por %p1859_p10, %p1858_p2 }
  0x91   : > { %p1854_p4 = pneg %p1853_p1 }
  0x93   : > { %p1861_p13 = pnand %p1860_p6, %p1854_p4 }
  0x95   : > { %1864 = shalt.err (!%p1861_p13)
}
  0x96   : > { %p2826_p7 = scmp.ne.s32.totalorder %s2808_s21, 0  ;;  %s1865_s26 = scalar_lea.hbm %s2756_s7, 16 }
  0x97   : > { %p1866_p11 = scmp.ne.s32.totalorder %s2756_s7, %s1865_s26  ;;  %p1872_p13 = scmp.lt.u32.totalorder %s1865_s26, %s2756_s7 }
  0x98   : > { %1627 = dma.hbm_to_vmem [thread:$0]  (!%p2826_p7), %s2755_s6, 16, %s316_s8, [#allocation15]  }
  0x99   : > { %p1868_p3 = pnand %p1866_p11, %p2825_p0 }
  0x9b   : > { %p1869_p8 = pneg %p1868_p3 }
  0x9d   : > { %p1874_p5 = pnand %p1872_p13, %p1869_p8 }
  0x9f   : > { %1877 = shalt.err (!%p1874_p5)
}
  0xa0   : > { %s1878_s29 = scalar_lea.vmem %s327_s25, 16  ;;  %s1885_s8 = scalar_lea.vmem %s327_s25, 32 }
  0xa1   : > { %p1879_p12 = scmp.ne.s32.totalorder %s327_s25, %s1878_s29  ;;  %p1886_p2 = scmp.lt.s32.totalorder %s327_s25, %s327_s25 }
  0xa2   : > { %p1887_p10 = scmp.lt.s32.totalorder %s1885_s8, %s1878_s29 }
  0xa3   : > { %p1881_p1 = pnand %p1879_p12, %p2825_p0 }
  0xa4   : > { %p1888_p6 = por %p1887_p10, %p1886_p2 }
  0xa5   : > { %p1882_p4 = pneg %p1881_p1 }
  0xa7   : > { %p1889_p9 = pnand %p1888_p6, %p1882_p4 }
  0xa9   : > { %1892 = shalt.err (!%p1889_p9)
}
  0xaa   : > { %1630 = dma.hbm_to_vmem [thread:$0]  (!%p2826_p7), %s2756_s7, 16, %s327_s25, [#allocation18]  }
  0xab   : > { %s2405_s3 = scalar_lea.hbm %s2749_s0, %s2272_s19  ;;  %s341_s10 = scalar_lea.vmem [#allocation5], %s2269_s12 }
  0xac   : > { %s349_s21 = sshll.u32 %s341_s10, 4  ;;  %s2414_s22 = scalar_lea.hbm %s2751_s2, %s2272_s19  ;;  %s2408_s21 = int_to_ptr.vmem [resolvable:$true] %s349_s21 }
  0xad   : > { %s338_s1 = scalar_lea.sflag [#allocation6], %s2226_s23  ;;  %s1893_s25 = scalar_lea.hbm %s2405_s3, 256 }
  0xae   : > { %p1894_p9 = scmp.ne.s32.totalorder %s2405_s3, %s1893_s25  ;;  %p2827_p0 = scmp.ne.s32.totalorder %s2818_s24, 0 }
  0xaf   : > { %s1898_s8 = scalar_lea.hbm %s2749_s0, 512  ;;  %p1899_p3 = scmp.lt.u32.totalorder %s2405_s3, %s2749_s0 }
  0xb0   : > { %p1896_p7 = pnand %p1894_p9, %p2827_p0  ;;  %p1900_p8 = scmp.lt.u32.totalorder %s1898_s8, %s1893_s25 }
  0xb1   : > { %p1902_p5 = scmp.lt.u32.totalorder %s1893_s25, %s2405_s3 }
  0xb2   : > { %p1897_p11 = pneg %p1896_p7  ;;  %p1901_p13 = por %p1900_p8, %p1899_p3 }
  0xb4   : > { %p1903_p12 = por %p1902_p5, %p1901_p13 }
  0xb6   : > { %p1904_p1 = pnand %p1903_p12, %p1897_p11 }
  0xb8   : > { %1907 = shalt.err (!%p1904_p1)
}
  0xb9   : > { %s1908_s19 = scalar_lea.vmem %s2408_s21, 256  ;;  %s2090_s17 = smov [#allocation5]  }
  0xba   : > { %p1909_p4 = scmp.ne.s32.totalorder %s2408_s21, %s1908_s19  ;;  %s1913_s14 = sshll.u32 %s2090_s17, 4  ;;  %s1914_s14 = int_to_ptr.vmem [resolvable:$false] %s1913_s14 }
  0xbb   : > { %s1915_s10 = scalar_lea.vmem %s1914_s14, 512  ;;  %p1916_p6 = scmp.lt.s32.totalorder %s2408_s21, %s1914_s14 }
  0xbc   : > { %p1911_p2 = pnand %p1909_p4, %p2827_p0  ;;  %p1917_p9 = scmp.lt.s32.totalorder %s1915_s10, %s1908_s19 }
  0xbe   : > { %p1912_p10 = pneg %p1911_p2  ;;  %p1918_p7 = por %p1917_p9, %p1916_p6 }
  0xc0   : > { %p1919_p3 = pnand %p1918_p7, %p1912_p10 }
  0xc2   : > { %1922 = shalt.err (!%p1919_p3)
}
  0xc3   : > { %p2828_p11 = scmp.ne.s32.totalorder %s2814_s16, 0  ;;  %s385_s26 = scalar_lea.vmem [#allocation10], %s2269_s12 }
  0xc4   : > { %s393_s11 = sshll.u32 %s385_s26, 4  ;;  %s1490_s25 = sshll.u32 %s2226_s23, 3  ;;  %s2445_s11 = int_to_ptr.vmem [resolvable:$true] %s393_s11 }
  0xc5   : > { %1634 = dma.hbm_to_vmem [thread:$0]  (!%p2828_p11), %s2405_s3, 256, %s2408_s21, %s338_s1, %s2820_s27, %s2820_s27, %s2819_s30  }
  0xc6   : > { %s1923_s5 = scalar_lea.hbm %s2414_s22, 256  ;;  %s1928_s20 = scalar_lea.hbm %s2751_s2, 512 }
  0xc7   : > { %p1924_p8 = scmp.ne.s32.totalorder %s2414_s22, %s1923_s5  ;;  %p1929_p12 = scmp.lt.u32.totalorder %s2414_s22, %s2751_s2 }
  0xc8   : > { %p1930_p1 = scmp.lt.u32.totalorder %s1928_s20, %s1923_s5  ;;  %p1932_p2 = scmp.lt.u32.totalorder %s1923_s5, %s2414_s22 }
  0xc9   : > { %p1926_p13 = pnand %p1924_p8, %p2827_p0 }
  0xca   : > { %p1931_p4 = por %p1930_p1, %p1929_p12 }
  0xcb   : > { %p1927_p5 = pneg %p1926_p13 }
  0xcc   : > { %p1933_p10 = por %p1932_p2, %p1931_p4 }
  0xce   : > { %p1934_p6 = pnand %p1933_p10, %p1927_p5 }
  0xd0   : > { %1937 = shalt.err (!%p1934_p6)
}
  0xd1   : > { %s1938_s12 = scalar_lea.vmem %s2445_s11, 256  ;;  %s2091_s3 = smov [#allocation10]  }
  0xd2   : > { %p1939_p9 = scmp.ne.s32.totalorder %s2445_s11, %s1938_s12  ;;  %s1943_s21 = sshll.u32 %s2091_s3, 4  ;;  %s1944_s21 = int_to_ptr.vmem [resolvable:$false] %s1943_s21 }
  0xd3   : > { %s1945_s1 = scalar_lea.vmem %s1944_s21, 512  ;;  %p1946_p8 = scmp.lt.s32.totalorder %s2445_s11, %s1944_s21 }
  0xd4   : > { %p1941_p7 = pnand %p1939_p9, %p2827_p0  ;;  %p1947_p13 = scmp.lt.s32.totalorder %s1945_s1, %s1938_s12 }
  0xd6   : > { %p1942_p3 = pneg %p1941_p7  ;;  %p1948_p12 = por %p1947_p13, %p1946_p8 }
  0xd8   : > { %p1949_p1 = pnand %p1948_p12, %p1942_p3 }
  0xda   : > { %1952 = shalt.err (!%p1949_p1)
}
  0xdb   : > { %1640 = dma.hbm_to_vmem [thread:$0]  (!%p2828_p11), %s2414_s22, 256, %s2445_s11, %s2302_s13, %s2820_s27, %s2820_s27, %s2819_s30  }
  0xdc   : > { %s1491_s17 = sshll.u32 %s2077_s9, 7  ;;  %s427_s14 = scalar_lea.vmem [#allocation13], %s1490_s25 }
  0xdd   : > { %s435_s10 = sshll.u32 %s427_s14, 4  ;;  %s433_s29 = scalar_lea.hbm %s2753_s4, %s1491_s17  ;;  %s436_s10 = int_to_ptr.vmem [resolvable:$true] %s435_s10 }
  0xde   : > { %s1953_s8 = scalar_lea.hbm %s433_s29, 128  ;;  %s1958_s19 = scalar_lea.hbm %s2753_s4, 256 }
  0xdf   : > { %p1954_p5 = scmp.ne.s32.totalorder %s433_s29, %s1953_s8  ;;  %p1959_p10 = scmp.lt.u32.totalorder %s433_s29, %s2753_s4 }
  0xe0   : > { %p1960_p6 = scmp.lt.u32.totalorder %s1958_s19, %s1953_s8  ;;  %p1962_p7 = scmp.lt.u32.totalorder %s1953_s8, %s433_s29 }
  0xe1   : > { %p1956_p4 = pnand %p1954_p5, %p2827_p0 }
  0xe2   : > { %p1961_p9 = por %p1960_p6, %p1959_p10 }
  0xe3   : > { %p1957_p2 = pneg %p1956_p4 }
  0xe4   : > { %p1963_p3 = por %p1962_p7, %p1961_p9 }
  0xe6   : > { %p1964_p8 = pnand %p1963_p3, %p1957_p2 }
  0xe8   : > { %1967 = shalt.err (!%p1964_p8)
}
  0xe9   : > { %s1968_s23 = scalar_lea.vmem %s436_s10, 128  ;;  %s2092_s30 = smov [#allocation13]  }
  0xea   : > { %p1969_p13 = scmp.ne.s32.totalorder %s436_s10, %s1968_s23  ;;  %s1973_s27 = sshll.u32 %s2092_s30, 4  ;;  %s1974_s27 = int_to_ptr.vmem [resolvable:$false] %s1973_s27 }
  0xeb   : > { %s1975_s22 = scalar_lea.vmem %s1974_s27, 256  ;;  %p1976_p5 = scmp.lt.s32.totalorder %s436_s10, %s1974_s27 }
  0xec   : > { %p1971_p12 = pnand %p1969_p13, %p2827_p0  ;;  %p1977_p4 = scmp.lt.s32.totalorder %s1975_s22, %s1968_s23 }
  0xee   : > { %p1972_p1 = pneg %p1971_p12  ;;  %p1978_p11 = por %p1977_p4, %p1976_p5 }
  0xf0   : > { %p1979_p6 = pnand %p1978_p11, %p1972_p1 }
  0xf2   : > { %1982 = shalt.err (!%p1979_p6)
}
  0xf3   : > { %p2829_p10 = scmp.ne.s32.totalorder %s2814_s16, 0  ;;  %p2830_p2 = scmp.ne.s32.totalorder %s2807_s18, 0 }
  0xf4   : > { %s2831_s11 = sld [smem:[#allocation27_spill]] (!%p2830_p2) }
  0xf5   : > { %1646 = dma.hbm_to_vmem [thread:$0]  (!%p2829_p10), %s433_s29, 128, %s436_s10, %s2345_s15  }
  0xf6   : > { %444 = sbr.rel (%p2830_p2) target bundleno = 1750 (0x6d6), region = 52  ;;  %s2832_s24 = sld [smem:[#allocation32_spill]] (!%p2830_p2) }
  0xfa   : > { %s2494_s25 = sand.u32 (!%p2830_p2), 1, %s2831_s11  }
  0xfb   : > { %s1493_s3 = sshll.u32 (!%p2830_p2), %s2494_s25, 4  ;;  %s447_s21 = scalar_lea.sflag (!%p2830_p2), [#allocation6], %s2494_s25 }
  0xfc   : > { %s2498_s1 = scalar_lea.vmem (!%p2830_p2), [#allocation5], %s1493_s3  ;;  %p2833_p0 = scmp.ne.s32.totalorder (!%p2830_p2), %s2832_s24, 0 }
  0xfe   : > { %2036 = dma.done.wait (%p2833_p0), %s447_s21, 256  }
  0xff   : > { %2038 = vsyncadd (%p2833_p0), %s447_s21, 4294967040  ;;  %s2834_s16 = sld [smem:[#allocation31_spill]]  ;;  %s2505_s17 = scalar_lea.vmem [#allocation8], %s1493_s3 }
 0x105   : > { %s455_s15 = sand.u32 1, %s2834_s16  }
 0x106   : > { %s456_s18 = scalar_lea.sflag [#allocation9], %s455_s15 }
 0x107   : > { %2040 = dma.done.wait (%p2833_p0), %s456_s18, 512  }
 0x108   : > { %2042 = vsyncadd (%p2833_p0), %s456_s18, 4294966784  ;;  %s1496_s14 = sshll.u32 %s2494_s25, 1  ;;  %s2512_s10 = scalar_lea.vmem [#allocation10], %s1493_s3 }
 0x109   : > { %s474_s26 = scalar_lea.sflag [#allocation12], %s455_s15  ;;  %s2514_s5 = scalar_lea.vmem [#allocation11], %s1496_s14 }
 0x10a   : > { %2044 = dma.done.wait (%p2833_p0), %s474_s26, 160  }
 0x10b   : > { %2046 = vsyncadd (%p2833_p0), %s474_s26, 4294967136  ;;  %s1497_s29 = sshll.u32 %s2494_s25, 3  ;;  %p2835_p11 = scmp.eq.s32.totalorder %s2834_s16, 0 }
 0x10c   : > { %s2523_s8 = scalar_lea.vmem [#allocation13], %s1497_s29 }
 0x10d   : > { %2048 = dma.done.wait (%p2835_p11), [#allocation15], 272   ;;  %p2836_p9 = pmov %p2835_p11 }
 0x10f   : > { %2050 = vsyncadd (%p2836_p9), [#allocation15], 4294967024  ;;  %p2837_p7 = pmov %p2836_p9 }
 0x111   : > { %2052 = dma.done.wait (%p2837_p7), [#allocation18], 16   ;;  %p2838_p3 = pmov %p2837_p7 }
 0x112   : > { %vm567_vm0 = vcmask 64512   ;;  %v2093_v0 = vmov 0.0   ;;  %vm2094_vm1 = vmmov 0   ;;  %v576_v1 = vld [vmem:[%s2505_s17] sm:$0xf]  ;;  %v2095_v13 = vmov 0  }
 0x113   : > { %2054 = vsyncadd (%p2838_p3), [#allocation18], 4294967280  ;;  %1541 = vmatprep.subr.bf16.mxu0 %v2093_v0  ;;  %568 = vst.msk [vmem:[#allocation4] sm:$0xff] %vm567_vm0, %v2093_v0  ;;  %1547 = vmatprep.subr.bf16.mxu1 %v2093_v0  ;;  %v577_v2 = vld [vmem:[%s2505_s17 + $0x4] sm:$0xf]  ;;  %v589_v3 = vsel %vm567_vm0, %v576_v1, 0 }
 0x114   : > { %569 = vst.msk [vmem:[#allocation4 + $0x8] sm:$0xff] %vm567_vm0, %v2093_v0  ;;  %570 = vst.msk [vmem:[#allocation4 + $0x10] sm:$0xff] %vm567_vm0, %v2093_v0  ;;  %1543 = vmatprep.mubr.msk.bf16.mxu0 %vm2094_vm1, %v2093_v0  ;;  %1549 = vmatprep.mubr.msk.bf16.mxu1 %vm2094_vm1, %v2093_v0  ;;  %v635_v4 = vsel %vm567_vm0, %v577_v2, 0  ;;  %v578_v5 = vld [vmem:[%s2505_s17 + $0x8] sm:$0xf]  ;;  %vm558_vm2 = vcmask 7168  }
 0x115   : > { %571 = vst.msk [vmem:[#allocation4 + $0x18] sm:$0xff] %vm567_vm0, %v2093_v0  ;;  %1542 = vmatpush3.bf16.xpose.msra.mxu0 %v589_v3  ;;  %1548 = vmatpush3.bf16.xpose.msra.mxu1 %v635_v4  ;;  %v579_v6 = vld [vmem:[%s2505_s17 + $0xc] sm:$0xf]  ;;  %v572_v7 = vld [vmem:[%s2498_s1] sm:$0xf]  ;;  %v681_v9 = vsel %vm567_vm0, %v578_v5, 0 }
 0x116   : > { %1553 = vmatprep.subr.bf16.mxu0 %v2093_v0  ;;  %1559 = vmatprep.subr.bf16.mxu1 %v2093_v0  ;;  %v573_v8 = vld [vmem:[%s2498_s1 + $0x4] sm:$0xf]  ;;  %v727_v10 = vsel %vm567_vm0, %v579_v6, 0  ;;  %v574_v11 = vld [vmem:[%s2498_s1 + $0x8] sm:$0xf]  ;;  %v2096_v14 = vmov -inf  }
 0x117   : > { %v575_v12 = vld [vmem:[%s2498_s1 + $0xc] sm:$0xf]  ;;  %1719 = vset.pattern.permute.xlu0 %v2095_v13  ;;  %1720 = vset.pattern.permute.xlu1 %v2095_v13  ;;  %559 = vst.msk [vmem:[#allocation2] sm:$0xff] %vm558_vm2, %v2096_v14  ;;  %560 = vst.msk [vmem:[#allocation2 + $0x8] sm:$0xff] %vm558_vm2, %v2096_v14  ;;  %v769_v15 = vld [vmem:[%s2514_s5] sm:$0x3] }
 0x118   : > { %561 = vst.msk [vmem:[#allocation2 + $0x10] sm:$0xff] %vm558_vm2, %v2096_v14  ;;  %562 = vst.msk [vmem:[#allocation2 + $0x18] sm:$0xff] %vm558_vm2, %v2096_v14  ;;  %vm770_vm3 = vnez %v769_v15  ;;  %v580_v59 = vld [vmem:[%s2512_s10] sm:$0xf]  ;;  %vm908_vm5 = vcmask 1043456   ;;  %s2097_s20 = smov 8  }
 0x119   : > { %563 = vst.msk [vmem:[#allocation3] sm:$0xff] %vm558_vm2, %v2093_v0  ;;  %564 = vst.msk [vmem:[#allocation3 + $0x8] sm:$0xff] %vm558_vm2, %v2093_v0  ;;  %v771_v16 = vsel %vm770_vm3, 16843009, %v2095_v13  ;;  %v910_v60 = vsel %vm908_vm5, %v580_v59, 0  ;;  %s2098_s28 = smov 16  }
 0x11a   : > { %565 = vst.msk [vmem:[#allocation3 + $0x10] sm:$0xff] %vm558_vm2, %v2093_v0  ;;  %566 = vst.msk [vmem:[#allocation3 + $0x18] sm:$0xff] %vm558_vm2, %v2093_v0  ;;  %v772_v17 = vunpack.c.0.s8 %v771_v16  ;;  %v581_v61 = vld [vmem:[%s2512_s10 + $0x4] sm:$0xf]  ;;  %v583_v16 = vld [vmem:[%s2512_s10 + $0xc] sm:$0xf] }
 0x11b   : > { %v956_v62 = vsel %vm908_vm5, %v581_v61, 0  ;;  %s2099_s19 = smov 24   ;;  %vm1154_vm6 = vcmask 130048   ;;  %vm1156_vm7 = vcmask 195584   ;;  %vm1176_vm8 = vcmask 261120   ;;  %s2841_s12 = sld [smem:[#allocation29_spill]] }
 0x11c   : > { %1544 = vmatmul.mubr.msk.bf16.vlgmr.msra.gmra.mrb[0].mxu0 %vm567_vm0, %v572_v7  ;;  %1550 = vmatmul.mubr.msk.bf16.vlgmr.msra.gmra.mrb[0].mxu1 %vm567_vm0, %v573_v8  ;;  %vm2588_vm4 = vcmp.ne.s32.totalorder %v772_v17, 0  ;;  %s2842_s13 = sld [smem:[#allocation33_spill]]  ;;  %s550_s30 = scalar_lea.vmem [#allocation19], %s1497_s29 }
 0x11d   : > { %1554 = vmatpush3.bf16.xpose.msra.mxu0 %v681_v9  ;;  %1560 = vmatpush3.bf16.xpose.msra.mxu1 %v727_v10  ;;  %s1266_s27 = sshll.u32 %s550_s30, 4  ;;  %s2843_s24 = sld [smem:[#allocation40_spill]]  ;;  %s2701_s27 = int_to_ptr.vmem [resolvable:$true] %s1266_s27 }
 0x11e   : > { %1555 = vmatprep.mubr.msk.bf16.mxu0 %vm2094_vm1, %v2093_v0  ;;  %1561 = vmatprep.mubr.msk.bf16.mxu1 %vm2094_vm1, %v2093_v0  ;;  %v2607_v43 = vld [vmem:[#allocation2] sm:$0xff]  ;;  %v2612_v46 = vld [vmem:[#allocation2 + $0x8] sm:$0xff]  ;;  %s1252_s21 = scalar_lea.sflag [#allocation7], %s2494_s25  ;;  %s1983_s1 = scalar_lea.vmem %s2701_s27, 128 }
 0x11f   : > { %1565 = vmatprep.subr.bf16.mxu0 %v2093_v0  ;;  %1571 = vmatprep.subr.bf16.mxu1 %v2093_v0  ;;  %v2622_v50 = vld [vmem:[#allocation2 + $0x10] sm:$0xff]  ;;  %v2632_v54 = vld [vmem:[#allocation2 + $0x18] sm:$0xff]  ;;  %p1984_p8 = scmp.ne.s32.totalorder %s2701_s27, %s1983_s1  ;;  %s2100_s16 = smov [#allocation19]  }
 0x120   : > { %s1987_s15 = sshll.u32 %s2100_s16, 4  ;;  %s1988_s15 = int_to_ptr.vmem [resolvable:$false] %s1987_s15 }
 0x121   : > { %s1516_s23 = sshll.u32 %s2841_s12, 7  ;;  %s1989_s18 = scalar_lea.vmem %s1988_s15, 256 }
 0x122   : > { %p2844_p13 = scmp.ne.s32.totalorder %s2842_s13, 0  ;;  %p1990_p5 = scmp.lt.s32.totalorder %s2701_s27, %s1988_s15 }
 0x123   : > { %s2699_s3 = scalar_lea.hbm %s2843_s24, %s1516_s23  ;;  %p1991_p4 = scmp.lt.s32.totalorder %s1989_s18, %s1983_s1 }
 0x124   : > { %1556 = vmatmul.mubr.msk.bf16.vlgmr.msra.gmra.mrb[4].mxu0 %vm567_vm0, %v574_v11  ;;  %1562 = vmatmul.mubr.msk.bf16.vlgmr.msra.gmra.mrb[4].mxu1 %vm567_vm0, %v575_v12  ;;  %v582_v11 = vld [vmem:[%s2512_s10 + $0x8] sm:$0xf]  ;;  %p1985_p12 = pnand %p1984_p8, %p2844_p13 }
 0x125   : > { %1567 = vmatprep.mubr.msk.bf16.mxu0 %vm2094_vm1, %v2093_v0  ;;  %1573 = vmatprep.mubr.msk.bf16.mxu1 %vm2094_vm1, %v2093_v0  ;;  %v1002_v15 = vsel %vm908_vm5, %v582_v11, 0  ;;  %p1992_p6 = por %p1991_p4, %p1990_p5 }
 0x126   : > { %1566 = vmatpush3.bf16.msra.mxu0 %v910_v60  ;;  %1572 = vmatpush3.bf16.msra.mxu1 %v956_v62  ;;  %p1986_p1 = pneg %p1985_p12 }
 0x127   : > { %1577 = vmatprep.subr.bf16.mxu0 %v2093_v0  ;;  %1583 = vmatprep.subr.bf16.mxu1 %v2093_v0 }
 0x128   : > { %p1993_p10 = pnand %p1992_p6, %p1986_p1 }
 0x1ef   : > { %v625_v19 = vpop.f32.mrb[0].mxu0  ;;  %v671_v20 = vpop.f32.mrb[0].mxu1 }
 0x1f0   : > { %v776_v21 = vsel %vm2588_vm4, -1e+09, %v625_v19  ;;  %v1545_v22 = vpop.f32.mrb[1].mxu0  ;;  %v2596_v23 = vsel %vm2588_vm4, -1e+09, %v671_v20  ;;  %v1551_v24 = vpop.f32.mrb[1].mxu1 }
 0x1f1   : > { %v628_v25 = vpop.f32.mrb[2].mxu0  ;;  %v784_v26 = vsel %vm567_vm0, %v776_v21, -inf  ;;  %v674_v27 = vpop.f32.mrb[2].mxu1  ;;  %v787_v30 = vsel %vm567_vm0, %v2596_v23, -inf  ;;  %v1048_v20 = vsel %vm908_vm5, %v583_v16, 0 }
 0x1f2   : > { %785 = vmax.xlane.f32.xlu0 %v784_v26  ;;  %v1546_v28 = vpop.f32.mrb[3].mxu0  ;;  %v1552_v29 = vpop.f32.mrb[3].mxu1 }
 0x1f6   : > { %788 = vmax.xlane.f32.xlu0 %v787_v30 }
 0x1f7   : > { %v717_v31 = vpop.f32.mrb[4].mxu0  ;;  %v763_v32 = vpop.f32.mrb[4].mxu1 }
 0x1f8   : > { %v778_v33 = vsel %vm2588_vm4, -1e+09, %v717_v31  ;;  %v1557_v34 = vpop.f32.mrb[5].mxu0  ;;  %v779_v35 = vsel %vm2588_vm4, -1e+09, %v763_v32  ;;  %v1563_v36 = vpop.f32.mrb[5].mxu1 }
 0x1f9   : > { %v720_v37 = vpop.f32.mrb[6].mxu0  ;;  %v790_v38 = vsel %vm567_vm0, %v778_v33, -inf  ;;  %v766_v39 = vpop.f32.mrb[6].mxu1  ;;  %v793_v42 = vsel %vm567_vm0, %v779_v35, -inf }
 0x1fa   : > { %791 = vmax.xlane.f32.xlu1 %v790_v38  ;;  %v1558_v40 = vpop.f32.mrb[7].mxu0  ;;  %v1564_v41 = vpop.f32.mrb[7].mxu1  ;;  %v846_v38 = vld [vmem:[#allocation3 + $0x10] sm:$0xff] }
 0x1fe   : > { %794 = vmax.xlane.f32.xlu1 %v793_v42  ;;  %v847_v42 = vld [vmem:[#allocation3 + $0x18] sm:$0xff] }
 0x27f   : > { %v786_v44 = vpop.xlane.xlu0 %785 }
 0x280   : > { %v2610_v45 = vmax.f32 %v2607_v43, %v786_v44 }
 0x282   : > { %v800_v47 = vsub.f32 %v2607_v43, %v2610_v45  ;;  %1098 = vst.msk [vmem:[#allocation2] sm:$0xff] %vm558_vm2, %v2610_v45  ;;  %814 = vperm.xlu0 %1719, %v2610_v45  }
 0x283   : > { %v789_v48 = vpop.xlane.xlu0 %788 }
 0x284   : > { %v2620_v49 = vmax.f32 %v2612_v46, %v789_v48  ;;  %v804_v34 = vmul.f32 1.442695, %v800_v47 }
 0x286   : > { %v801_v51 = vsub.f32 %v2612_v46, %v2620_v49  ;;  %1099 = vst.msk [vmem:[#allocation2 + $0x8] sm:$0xff] %vm558_vm2, %v2620_v49  ;;  %819 = vperm.xlu1 %1720, %v2620_v49  }
 0x287   : > { %v792_v52 = vpop.xlane.xlu1 %791 }
 0x288   : > { %v2630_v53 = vmax.f32 %v2622_v50, %v792_v52  ;;  %v806_v29 = vmul.f32 1.442695, %v801_v51 }
 0x28a   : > { %v802_v55 = vsub.f32 %v2622_v50, %v2630_v53  ;;  %1100 = vst.msk [vmem:[#allocation2 + $0x10] sm:$0xff] %vm558_vm2, %v2630_v53  ;;  %824 = vperm.xlu1 %1720, %v2630_v53   ;;  %v844_v50 = vld [vmem:[#allocation3] sm:$0xff] }
 0x28b   : > { %v795_v56 = vpop.xlane.xlu1 %794 }
 0x28c   : > { %v2640_v57 = vmax.f32 %v2632_v54, %v795_v56  ;;  %v808_v27 = vmul.f32 1.442695, %v802_v55  ;;  %v874_v56 = vld [vmem:[#allocation4 + $0x8] sm:$0xff] }
 0x28e   : > { %v803_v58 = vsub.f32 %v2632_v54, %v2640_v57  ;;  %1101 = vst.msk [vmem:[#allocation2 + $0x18] sm:$0xff] %vm558_vm2, %v2640_v57  ;;  %829 = vperm.xlu1 %1720, %v2640_v57  }
 0x290   : > { %v810_v30 = vmul.f32 1.442695, %v803_v58 }
 0x301   : > { %v815_v63 = vpop.permute.xlu0 %814 }
 0x302   : > { %v832_v1 = vsub.f32 %v776_v21, %v815_v63  ;;  %v875_v63 = vld [vmem:[#allocation4 + $0x10] sm:$0xff] }
 0x304   : > { %v836_v2 = vmul.f32 1.442695, %v832_v1 }
 0x305   : > { %v820_v3 = vpop.permute.xlu1 %819 }
 0x306   : > { %1723 = vpow2.f32 %v836_v2  ;;  %v833_v4 = vsub.f32 %v2596_v23, %v820_v3 }
 0x308   : > { %v838_v5 = vmul.f32 1.442695, %v833_v4 }
 0x309   : > { %v825_v6 = vpop.permute.xlu1 %824 }
 0x30a   : > { %1725 = vpow2.f32 %v838_v5  ;;  %v834_v7 = vsub.f32 %v778_v33, %v825_v6 }
 0x30c   : > { %v840_v8 = vmul.f32 1.442695, %v834_v7 }
 0x30d   : > { %v830_v9 = vpop.permute.xlu1 %829 }
 0x30e   : > { %1727 = vpow2.f32 %v840_v8  ;;  %v835_v10 = vsub.f32 %v779_v35, %v830_v9  ;;  %v845_v35 = vld [vmem:[#allocation3 + $0x8] sm:$0xff]  ;;  %v876_v8 = vld [vmem:[#allocation4 + $0x18] sm:$0xff] }
 0x310   : > { %v1724_v12 = vpop.eup %1723  ;;  %v842_v13 = vmul.f32 1.442695, %v835_v10 }
 0x311   : > { %v901_v14 = vpack.c.bf16 %v1724_v12, %v1724_v12  ;;  %v852_v28 = vsel %vm567_vm0, %v1724_v12, 0.0 }
 0x312   : > { %1729 = vpow2.f32 %v842_v13 }
 0x313   : > { %1568 = vmatmul.mubr.msk.bf16.vlgmr.msra.gmra.mrb[8].mxu0 %vm567_vm0, %v901_v14  ;;  %1731 = vpow2.f32 %v808_v27 }
 0x314   : > { %v1726_v17 = vpop.eup %1725  ;;  %1578 = vmatpush3.bf16.msra.mxu0 %v1002_v15  ;;  %1579 = vmatprep.mubr.msk.bf16.mxu0 %vm2094_vm1, %v2093_v0  ;;  %1733 = vpow2.f32 %v806_v29 }
 0x315   : > { %v855_v18 = vsel %vm567_vm0, %v1726_v17, 0.0  ;;  %v902_v19 = vpack.c.bf16 %v1726_v17, %v1726_v17  ;;  %1589 = vmatprep.subr.bf16.mxu0 %v2093_v0  ;;  %1735 = vpow2.f32 %v810_v30 }
 0x316   : > { %856 = vadd.xlane.f32.xlu1 %v855_v18  ;;  %1737 = vpow2.f32 %v804_v34 }
 0x317   : > { %1574 = vmatmul.mubr.msk.bf16.vlgmr.msra.gmra.mrb[8].mxu1 %vm567_vm0, %v902_v19 }
 0x318   : > { %v1728_v21 = vpop.eup %1727  ;;  %1584 = vmatpush3.bf16.msra.mxu1 %v1048_v20  ;;  %1585 = vmatprep.mubr.msk.bf16.mxu1 %vm2094_vm1, %v2093_v0 }
 0x319   : > { %v858_v22 = vsel %vm567_vm0, %v1728_v21, 0.0  ;;  %v903_v23 = vpack.c.bf16 %v1728_v21, %v1728_v21 }
 0x31a   : > { %859 = vadd.xlane.f32.xlu0 %v858_v22  ;;  %v1721_v22 = vld [vmem:[#allocation14] sm:$0xff]  }
 0x31b   : > { %1580 = vmatmul.mubr.msk.bf16.vlgmr.msra.gmra.mrb[12].mxu0 %vm567_vm0, %v903_v23 }
 0x31c   : > { %v1730_v24 = vpop.eup %1729  ;;  %1593 = vmatprep.mubr.msk.bf16.mxu0 %vm2094_vm1, %v2093_v0  ;;  %1590 = vmatpush3.bf16.msra.mxu0 %v1721_v22 }
 0x31d   : > { %v861_v25 = vsel %vm567_vm0, %v1730_v24, 0.0  ;;  %v904_v26 = vpack.c.bf16 %v1730_v24, %v1730_v24  ;;  %v1732_v31 = vpop.eup %1731  ;;  %v873_v24 = vld [vmem:[#allocation4] sm:$0xff]  ;;  %1591 = vmatprep.subr.bf16.mxu0 %v2093_v0 }
 0x31e   : > { %862 = vadd.xlane.f32.xlu1 %v861_v25  ;;  %v1734_v32 = vpop.eup %1733  ;;  %v850_v40 = vmul.f32 %v1732_v31, %v846_v38  ;;  %v1722_v25 = vld [vmem:[#allocation14 + $0x8] sm:$0xff]  }
 0x31f   : > { %1586 = vmatmul.mubr.msk.bf16.vlgmr.msra.gmra.mrb[12].mxu1 %vm567_vm0, %v904_v26  ;;  %v1736_v33 = vpop.eup %1735  ;;  %v849_v36 = vmul.f32 %v1734_v32, %v845_v35 }
 0x320   : > { %v851_v46 = vmul.f32 %v1736_v33, %v847_v42  ;;  %v1738_v48 = vpop.eup %1737  ;;  %1592 = vmatpush3.bf16.msra.mxu0 %v1722_v25 }
 0x321   : > { %v848_v47 = vmul.f32 %v1738_v48, %v844_v50 }
 0x322   : > { %853 = vadd.xlane.f32.xlu1 %v852_v28 }
 0x330   : > { %889 = vperm.xlu0 %1719, %v1732_v31  }
 0x333   : > { %884 = vperm.xlu1 %1720, %v1734_v32  }
 0x337   : > { %894 = vperm.xlu1 %1720, %v1736_v33  }
 0x3a3   : > { %v857_v37 = vpop.xlane.xlu1 %856 }
 0x3a4   : > { %v865_v39 = vadd.f32 %v857_v37, %v849_v36 }
 0x3a6   : > { %870 = vst.msk [vmem:[#allocation3 + $0x8] sm:$0xff] %vm558_vm2, %v865_v39 }
 0x3a7   : > { %v860_v41 = vpop.xlane.xlu0 %859 }
 0x3a8   : > { %v866_v44 = vadd.f32 %v860_v41, %v850_v40 }
 0x3aa   : > { %871 = vst.msk [vmem:[#allocation3 + $0x10] sm:$0xff] %vm558_vm2, %v866_v44 }
 0x3ab   : > { %v863_v49 = vpop.xlane.xlu1 %862 }
 0x3ac   : > { %v867_v43 = vadd.f32 %v863_v49, %v851_v46 }
 0x3ad   : > { %v1110_v45 = vld [vmem:[#allocation3 + $0x8] sm:$0xff] }
 0x3ae   : > { %872 = vst.msk [vmem:[#allocation3 + $0x18] sm:$0xff] %vm558_vm2, %v867_v43  ;;  %1120 = vperm.xlu1 %1720, %v1110_v45   ;;  %v1163_v45 = vld [vmem:[%s2523_s8] sm:$0xff] }
 0x3af   : > { %v854_v51 = vpop.xlane.xlu1 %853  ;;  %v890_v1 = vpop.permute.xlu0 %889 }
 0x3b0   : > { %v864_v52 = vadd.f32 %v854_v51, %v848_v47  ;;  %v899_v6 = vmul.f32 %v890_v1, %v875_v63 }
 0x3b1   : > { %v1111_v53 = vld [vmem:[#allocation3 + $0x10] sm:$0xff] }
 0x3b2   : > { %869 = vst.msk [vmem:[#allocation3] sm:$0xff] %vm558_vm2, %v864_v52  ;;  %1125 = vperm.xlu1 %1720, %v1111_v53  }
 0x3b3   : > { %v885_v57 = vpop.permute.xlu1 %884 }
 0x3b4   : > { %v898_v61 = vmul.f32 %v885_v57, %v874_v56 }
 0x3b5   : > { %v1112_v54 = vld [vmem:[#allocation3 + $0x18] sm:$0xff] }
 0x3b6   : > { %1130 = vperm.xlu0 %1719, %v1112_v54   ;;  %879 = vperm.xlu1 %1720, %v1738_v48  }
 0x3b7   : > { %v895_v9 = vpop.permute.xlu1 %894 }
 0x3b8   : > { %v900_v14 = vmul.f32 %v895_v9, %v876_v8 }
 0x3b9   : > { %v1109_v55 = vld [vmem:[#allocation3] sm:$0xff] }
 0x3ba   : > { %1115 = vperm.xlu0 %1719, %v1109_v55  }
 0x3e6   : > { %v946_v58 = vpop.f32.mrb[8].mxu0 }
 0x3e7   : > { %v1569_v59 = vpop.f32.mrb[9].mxu0 }
 0x3e8   : > { %v949_v60 = vpop.f32.mrb[10].mxu0 }
 0x3e9   : > { %v1570_v62 = vpop.f32.mrb[11].mxu0 }
 0x3ea   : > { %v992_v2 = vpop.f32.mrb[8].mxu1 }
 0x3eb   : > { %v1091_v3 = vadd.f32 %v992_v2, %v898_v61  ;;  %v1575_v4 = vpop.f32.mrb[9].mxu1  ;;  %v1513_v2 = vld [vmem:[#allocation16] ss:$0 sm:$0xff] }
 0x3ec   : > { %v995_v5 = vpop.f32.mrb[10].mxu1  ;;  %v1514_v4 = vld [vmem:[#allocation17] ss:$0 sm:$0xff] }
 0x3ed   : > { %1095 = vst.msk [vmem:[#allocation4 + $0x8] sm:$0xff] %vm567_vm0, %v1091_v3  ;;  %v1576_v7 = vpop.f32.mrb[11].mxu1 }
 0x3ee   : > { %v1038_v10 = vpop.f32.mrb[12].mxu0 }
 0x3ef   : > { %v1092_v11 = vadd.f32 %v1038_v10, %v899_v6  ;;  %v1581_v12 = vpop.f32.mrb[13].mxu0 }
 0x3f0   : > { %v1041_v13 = vpop.f32.mrb[14].mxu0 }
 0x3f1   : > { %1096 = vst.msk [vmem:[#allocation4 + $0x10] sm:$0xff] %vm567_vm0, %v1092_v11  ;;  %v1582_v15 = vpop.f32.mrb[15].mxu0 }
 0x3f2   : > { %v1084_v16 = vpop.f32.mrb[12].mxu1 }
 0x3f3   : > { %v1093_v17 = vadd.f32 %v1084_v16, %v900_v14  ;;  %v1587_v18 = vpop.f32.mrb[13].mxu1 }
 0x3f4   : > { %v1087_v19 = vpop.f32.mrb[14].mxu1  ;;  %v1106_v31 = vld [vmem:[#allocation4 + $0x8] sm:$0xff] }
 0x3f5   : > { %1097 = vst.msk [vmem:[#allocation4 + $0x18] sm:$0xff] %vm567_vm0, %v1093_v17  ;;  %v1588_v20 = vpop.f32.mrb[15].mxu1 }
 0x3f8   : > { %v1107_v34 = vld [vmem:[#allocation4 + $0x10] sm:$0xff] }
 0x3fc   : > { %v1108_v36 = vld [vmem:[#allocation4 + $0x18] sm:$0xff] }
 0x42d   : > { %v1121_v21 = vpop.permute.xlu1 %1120 }
 0x42e   : > { %1739 = vrcp.f32 %v1121_v21 }
 0x431   : > { %v1126_v23 = vpop.permute.xlu1 %1125 }
 0x432   : > { %1741 = vrcp.f32 %v1126_v23 }
 0x435   : > { %v1131_v26 = vpop.permute.xlu0 %1130  ;;  %v880_v27 = vpop.permute.xlu1 %879 }
 0x436   : > { %1743 = vrcp.f32 %v1131_v26  ;;  %v897_v28 = vmul.f32 %v880_v27, %v873_v24 }
 0x438   : > { %v1740_v29 = vpop.eup %1739  ;;  %v1090_v30 = vadd.f32 %v946_v58, %v897_v28 }
 0x439   : > { %v1136_v32 = vmul.f32 %v1740_v29, %v1106_v31  ;;  %v1116_v38 = vpop.permute.xlu0 %1115 }
 0x43a   : > { %1094 = vst.msk [vmem:[#allocation4] sm:$0xff] %vm567_vm0, %v1090_v30  ;;  %1745 = vrcp.f32 %v1116_v38 }
 0x43b   : > { %1142 = vrot.lane.b32.xlu1 %v1136_v32, %s2097_s20 }
 0x43c   : > { %v1742_v33 = vpop.eup %1741 }
 0x43d   : > { %v1138_v35 = vmul.f32 %v1742_v33, %v1107_v34 }
 0x43f   : > { %1146 = vrot.lane.b32.xlu0 %v1138_v35, %s2098_s28 }
 0x440   : > { %v1744_v0 = vpop.eup %1743 }
 0x441   : > { %v1140_v37 = vmul.f32 %v1744_v0, %v1108_v36  ;;  %v1105_v40 = vld [vmem:[#allocation4] sm:$0xff] }
 0x443   : > { %1150 = vrot.lane.b32.xlu1 %v1140_v37, %s2099_s19 }
 0x444   : > { %v1746_v39 = vpop.eup %1745 }
 0x445   : > { %v1134_v42 = vmul.f32 %v1746_v39, %v1105_v40 }
 0x4ad   : > { %v1143_v41 = vpop.permute.xlu1 %1142 }
 0x4ae   : > { %v1153_v46 = vsel %vm567_vm0, %v1134_v42, %v1143_v41 }
 0x4b1   : > { %v1147_v44 = vpop.permute.xlu0 %1146 }
 0x4b2   : > { %v1155_v48 = vsel %vm1154_vm6, %v1153_v46, %v1147_v44 }
 0x4b5   : > { %v1151_v49 = vpop.permute.xlu1 %1150 }
 0x4b6   : > { %v1157_v50 = vsel %vm1156_vm7, %v1155_v48, %v1151_v49 }
 0x4b7   : > { %v1158_v43 = vpack.c.bf16 %v1157_v50, %v1157_v50 }
 0x4b9   : > { %1594 = vmatmul.mubr.msk.bf16.vlgmr.msra.gmra.mrb[16].mxu0 %vm1176_vm8, %v1158_v43 }
 0x58c   : > { %v1214_v47 = vpop.f32.mrb[16].mxu0 }
 0x58d   : > { %v1215_v51 = vadd.f32 %v1214_v47, %v1163_v45  ;;  %v1595_v52 = vpop.f32.mrb[17].mxu0 }
 0x58e   : > { %v1217_v53 = vpop.f32.mrb[18].mxu0 }
 0x58f   : > { %v1596_v54 = vpop.f32.mrb[19].mxu0  ;;  %v1220_v55 = vsel %vm1176_vm8, %v1215_v51, 0.0 }
 0x590   : > { %1221 = vadd.xlane.f32.xlu0 %v1220_v55 }
 0x61d   : > { %v1222_v56 = vpop.xlane.xlu0 %1221 }
 0x61e   : > { %v1224_v57 = vmul.f32 0.03125, %v1222_v56 }
 0x620   : > { %v1225_v58 = vsub.f32 %v1215_v51, %v1224_v57 }
 0x622   : > { %v1226_v59 = vmul.f32 %v1225_v58, %v1225_v58 }
 0x624   : > { %v1227_v60 = vsel %vm1176_vm8, %v1226_v59, 0.0 }
 0x625   : > { %1228 = vadd.xlane.f32.xlu1 %v1227_v60 }
 0x6b2   : > { %v1229_v61 = vpop.xlane.xlu1 %1228 }
 0x6b3   : > { %v1230_v62 = vmul.f32 0.03125, %v1229_v61 }
 0x6b5   : > { %v1231_v63 = vadd.f32 1e-05, %v1230_v62 }
 0x6b7   : > { %1747 = vrsqrt.f32 %v1231_v63 }
 0x6c1   : > { %v1748_v1 = vpop.eup %1747 }
 0x6c2   : > { %v1233_v3 = vmul.f32 %v1748_v1, %v1225_v58 }
 0x6c4   : > { %v1241_v5 = vmul.f32 %v1513_v2, %v1233_v3 }
 0x6c6   : > { %v1249_v6 = vadd.f32 %v1514_v4, %v1241_v5 }
 0x6c8   : > { %1250 = vst.msk [vmem:[%s550_s30] sm:$0xff] %vm1176_vm8, %v1249_v6 }
 0x6c9   : > { %1996 = shalt.err (!%p1993_p10)
}
 0x6ca   : > { %s1997_s25 = scalar_lea.hbm %s2699_s3, 128  ;;  %s2001_s10 = scalar_lea.hbm %s2843_s24, 256 }
 0x6cb   : > { %p1998_p2 = scmp.ne.s32.totalorder %s2699_s3, %s1997_s25  ;;  %p2002_p9 = scmp.lt.u32.totalorder %s2699_s3, %s2843_s24 }
 0x6cc   : > { %p2003_p7 = scmp.lt.u32.totalorder %s2001_s10, %s1997_s25  ;;  %p2005_p8 = scmp.lt.u32.totalorder %s1997_s25, %s2699_s3 }
 0x6cd   : > { %p1999_p0 = pnand %p1998_p2, %p2844_p13 }
 0x6ce   : > { %p2004_p3 = por %p2003_p7, %p2002_p9 }
 0x6cf   : > { %p2000_p11 = pneg %p1999_p0 }
 0x6d0   : > { %p2006_p12 = por %p2005_p8, %p2004_p3 }
 0x6d2   : > { %p2007_p1 = pnand %p2006_p12, %p2000_p11 }
 0x6d4   : > { %2010 = shalt.err (!%p2007_p1)
}
 0x6d5   : > { %1619 = dma.vmem_to_hbm [thread:$0]  (%p2844_p13), %s2701_s27, 128, %s2699_s3, %s1252_s21  }
 0x6d6 PF: > { %s2845_s29 = sld [smem:[#allocation26_spill]]  ;;  %s2846_s8 = sld [smem:[#allocation34_spill]] }
 0x6d7   : > { %s2847_s20 = sld [smem:[#allocation30_spill]] }
 0x6dc   : > { %s1278_s28 = sand.u32 1, %s2845_s29   ;;  %p2848_p5 = scmp.ne.s32.totalorder %s2846_s8, 0 }
 0x6dd   : > { %p2849_p4 = scmp.ge.s32.totalorder %s2847_s20, 2  ;;  %s1279_s19 = scalar_lea.sflag [#allocation7], %s1278_s28 }
 0x6df   : > { %p1648_p6 = pnand %p2849_p4, %p2848_p5 }
 0x6e1   : > { %2056 = dma.done.wait (!%p1648_p6), %s1279_s19, 128  }
 0x6e2   : > { %2058 = vsyncadd (!%p1648_p6), %s1279_s19, 4294967168  ;;  %s32_s10 = sadd.s32 1, %s2847_s20   ;;  %s2850_s27 = sld [smem:[#allocation27_spill]] }
 0x6e3   : > { %p29_p10 = scmp.ge.s32.totalorder %s32_s10, 4   ;;  %s2851_s28 = sld [smem:[#allocation28_spill]] }
 0x6e4   : > { %s2852_s29 = sld [smem:[#allocation36_spill]]  ;;  %s2853_s12 = sld [smem:[#allocation35_spill]] }
 0x6e5   : > { %s2854_s30 = smov %s2077_s9  ;;  %31 = sbr.rel (!%p29_p10) target bundleno = 17 (0x11), region = 165 }
 0x6ea   : > { %s2855_s9 = smov %s2853_s12 }
 0x6ec   :  { %1284 = vsyncpa [#allocation6], 1 }
 0x6ed   :  { %1286 = vsyncpa [#allocation6 + $0x1], 1 }
 0x6ee   :  { %1287 = vsyncpa [#allocation9], 1 }
 0x6ef   :  { %1289 = vsyncpa [#allocation9 + $0x1], 1 }
 0x6f0   :  { %1290 = vsyncpa [#allocation12], 1 }
 0x6f1   :  { %1292 = vsyncpa [#allocation12 + $0x1], 1 }
 0x6f2   :  { %1293 = vsyncpa [#allocation15], 1 }
 0x6f3   :  { %1294 = vsyncpa [#allocation18], 1 }
 0x6f4   :  { %1295 = vsyncpa [#allocation7], 1 }
 0x6f5   :  { %1297 = vsyncpa [#allocation7 + $0x1], 1 }

</bundles_post_ra>
